<compile_context>
chip_gen: v5e
topology: v5e:2x2
jax: 0.10.0
libtpu: 0.0.40
codegen_flags: <defaults>
</compile_context>

<pallas_src>
import functools
import math

import jax
import jax.numpy as jnp
from jax import lax
from jax.experimental import pallas as pl
from jax.experimental.pallas import tpu as pltpu

# ----------------------------------------------------------------------------
# Small synthetic configuration consistent with DallE.__init__ / forward
# ----------------------------------------------------------------------------
NUM_WORDS = 32              # text vocab size
IMAGE_SIZE = 4              # latent grid side  -> image_size**2 image tokens
MAX_TEXT_LEN = 8
IMAGE_VOCAB_SIZE = 16       # VQ-VAE codebook size
LATENT_DIM = 16             # codebook embedding dim
IN_CHANNELS = 3
PATCH = 4                   # encoder conv kernel == stride (16x16 im -> 4x4 latent)
N_EMBD = 32
N_HEAD = 2
N_LAYER = 2
HEAD_DIM = N_EMBD // N_HEAD
SEQ_LEN = MAX_TEXT_LEN + IMAGE_SIZE * IMAGE_SIZE          # 24
VOCAB = NUM_WORDS + IMAGE_VOCAB_SIZE                      # 48
VOCAB_PAD = 128                                           # lane-dense logits slab
CPP = IN_CHANNELS * PATCH * PATCH                         # 48
LI = IMAGE_SIZE * IMAGE_SIZE                              # 16

# ---- bf16 weight slab layout (rows x 128 lanes) ----
_W_LAYER_ROWS = 3 * N_EMBD                                # 96 rows / layer
_W_EMB_ROW = N_LAYER * _W_LAYER_ROWS                      # 192: tok_emb^T (E,128)
_W_HEAD_ROW = _W_EMB_ROW + N_EMBD                         # 224: head_w    (E,128)
_W_ROWS = _W_HEAD_ROW + N_EMBD                            # 256

# ---- f32 vector slab layout (rows x 128 lanes) ----
_V_LAYER_ROWS = 4                                         # ln row, qkv_b|proj_b, fc_b, fcp_b
_V_HEADB_ROW = N_LAYER * _V_LAYER_ROWS                    # 8
_V_LNF_ROW = _V_HEADB_ROW + 1                             # 9
_V_POS_ROW = _V_LNF_ROW + 1                               # 10 .. +SEQ_LEN
_V_ENCW_ROW = _V_POS_ROW + SEQ_LEN                        # 34 .. +CPP
_V_ENCB_ROW = _V_ENCW_ROW + CPP                           # 82 (enc_b | e2)
_V_CB_ROW = _V_ENCB_ROW + 1                               # 83 .. +K
_V_ROWS = ((_V_CB_ROW + IMAGE_VOCAB_SIZE + 7) // 8) * 8   # 104


# ----------------------------------------------------------------------------
# In-kernel helpers
# ----------------------------------------------------------------------------
def _layernorm(x, g, b):
    mu = jnp.mean(x, axis=-1, keepdims=True)
    var = jnp.mean((x - mu) ** 2, axis=-1, keepdims=True)
    return (x - mu) * lax.rsqrt(var + 1e-5) * g + b


def _dot_nt(a, b):
    # a (M, K) . b (N, K) -> (M, N): contraction on last dims, no explicit .T
    return lax.dot_general(a, b, dimension_numbers=(((1,), (1,)), ((), ())),
                           preferred_element_type=jnp.float32)


# ----------------------------------------------------------------------------
# Fused per-batch DallE forward kernel (grid = (batch,))
# ----------------------------------------------------------------------------
def _dalle_kernel(patches_ref, text_ref, w_ref, v_ref,
                  logits_ref, loss_t_ref, loss_i_ref):
    f32 = jnp.float32
    bf16 = jnp.bfloat16
    lt, li, seq = MAX_TEXT_LEN, LI, SEQ_LEN
    E, D, K = N_EMBD, LATENT_DIM, IMAGE_VOCAB_SIZE

    # ------------------ VAE encoder + nearest-codebook lookup (f32) -----------
    patches = patches_ref[...]                                    # (li, CPP)
    enc_w = v_ref[_V_ENCW_ROW:_V_ENCW_ROW + CPP, 0:D]             # (CPP, D)
    enc_b = v_ref[_V_ENCB_ROW:_V_ENCB_ROW + 1, 0:D]               # (1, D)
    e2 = v_ref[_V_ENCB_ROW:_V_ENCB_ROW + 1, D:D + K]              # (1, K) |cb|^2
    cb = v_ref[_V_CB_ROW:_V_CB_ROW + K, 0:D]                      # (K, D)

    z = jnp.dot(patches, enc_w, preferred_element_type=f32) + enc_b    # (li, D)
    cross = _dot_nt(z, cb)                                         # (li, K)
    dist = e2 - 2.0 * cross              # argmin-equivalent (|z|^2 term dropped)
    dmin = jnp.min(dist, axis=-1, keepdims=True)
    kcol = lax.broadcasted_iota(jnp.int32, dist.shape, 1)
    img_idx = jnp.min(jnp.where(dist <= dmin, kcol, K),
                      axis=-1, keepdims=True)                      # (li, 1) int32

    # ------------------ one-hot over combined vocab + fused embedding ---------
    seq_idx = jnp.concatenate([text_ref[...], img_idx + NUM_WORDS], axis=0)  # (seq,1)
    col = lax.broadcasted_iota(jnp.int32, (seq, VOCAB_PAD), 1)
    onehot = (col == seq_idx).astype(f32)                          # (seq, 128)

    tok_emb_t = w_ref[_W_EMB_ROW:_W_EMB_ROW + E, :]                # (E, 128) bf16
    pos = v_ref[_V_POS_ROW:_V_POS_ROW + seq, 0:E]                  # (seq, E)
    x = _dot_nt(onehot.astype(bf16), tok_emb_t) + pos              # (seq, E) f32

    # ------------------ GPT transformer blocks --------------------------------
    scale = 1.0 / math.sqrt(HEAD_DIM)
    ri = lax.broadcasted_iota(jnp.int32, (seq, seq), 0)
    ci = lax.broadcasted_iota(jnp.int32, (seq, seq), 1)
    causal = ci <= ri

    for layer in range(N_LAYER):
        w0 = layer * _W_LAYER_ROWS
        v0 = layer * _V_LAYER_ROWS
        qkv_w = w_ref[w0:w0 + E, 0:3 * E]                          # (32, 96) bf16
        proj_w = w_ref[w0:w0 + E, 3 * E:4 * E]                     # (32, 32) bf16
        fc_w = w_ref[w0 + E:w0 + 2 * E, :]                         # (32,128) bf16
        fcp_w_t = w_ref[w0 + 2 * E:w0 + 3 * E, :]                  # (32,128) bf16 (fc_proj^T)
        ln1_g = v_ref[v0:v0 + 1, 0:E]
        ln1_b = v_ref[v0:v0 + 1, E:2 * E]
        ln2_g = v_ref[v0:v0 + 1, 2 * E:3 * E]
        ln2_b = v_ref[v0:v0 + 1, 3 * E:4 * E]
        qkv_b = v_ref[v0 + 1:v0 + 2, 0:3 * E]
        proj_b = v_ref[v0 + 1:v0 + 2, 3 * E:4 * E]
        fc_b = v_ref[v0 + 2:v0 + 3, :]
        fcp_b = v_ref[v0 + 3:v0 + 4, 0:E]

        h = _layernorm(x, ln1_g, ln1_b)
        qkv = jnp.dot(h.astype(bf16), qkv_w,
                      preferred_element_type=f32) + qkv_b          # (seq, 96)

        heads = []
        for nh in range(N_HEAD):
            c0 = nh * HEAD_DIM
            q = qkv[:, c0:c0 + HEAD_DIM].astype(bf16)
            k = qkv[:, E + c0:E + c0 + HEAD_DIM].astype(bf16)
            v = qkv[:, 2 * E + c0:2 * E + c0 + HEAD_DIM].astype(bf16)
            s = _dot_nt(q, k) * scale                              # (seq, seq) f32
            s = jnp.where(causal, s, -1e30)
            m = jnp.max(s, axis=-1, keepdims=True)
            p = jnp.exp(s - m)
            p = p * pl.reciprocal(jnp.sum(p, axis=-1, keepdims=True), approx=True)
            heads.append(jnp.dot(p.astype(bf16), v, preferred_element_type=f32))
        o = jnp.concatenate(heads, axis=-1)                        # (seq, E)
        x = x + jnp.dot(o.astype(bf16), proj_w,
                        preferred_element_type=f32) + proj_b

        h2 = _layernorm(x, ln2_g, ln2_b)
        h2 = jnp.dot(h2.astype(bf16), fc_w, preferred_element_type=f32) + fc_b
        # TODO(synk): reference GPT source unavailable; tanh-approx GELU assumed.
        h2 = jax.nn.gelu(h2, approximate=True)
        h2 = _dot_nt(h2.astype(bf16), fcp_w_t) + fcp_b
        x = x + h2

    # ------------------ final LN + LM head (lane-dense logits slab) ------------
    lnf_g = v_ref[_V_LNF_ROW:_V_LNF_ROW + 1, 0:E]
    lnf_b = v_ref[_V_LNF_ROW:_V_LNF_ROW + 1, E:2 * E]
    head_w = w_ref[_W_HEAD_ROW:_W_HEAD_ROW + E, :]                 # (E, 128) bf16
    head_b = v_ref[_V_HEADB_ROW:_V_HEADB_ROW + 1, :]               # (1, 128)

    xf = _layernorm(x, lnf_g, lnf_b)
    logits = jnp.dot(xf.astype(bf16), head_w,
                     preferred_element_type=f32) + head_b          # (seq, 128)
    logits_ref[...] = logits

    # ------------------ losses (next-token CE over the 48-way vocab) -----------
    masked = jnp.where(col < VOCAB, logits, -1e30)
    m = jnp.max(masked, axis=-1, keepdims=True)
    lse = m + jnp.log(jnp.sum(jnp.exp(masked - m), axis=-1, keepdims=True))  # (seq,1)

    # row r predicts the token at position r+1; its one-hot is onehot[r+1].
    tgt = jnp.sum(logits[0:seq - 1, :] * onehot[1:seq, :],
                  axis=-1, keepdims=True)                          # (seq-1, 1)
    nll = lse[0:seq - 1, :] - tgt
    rr = lax.broadcasted_iota(jnp.int32, (seq - 1, 1), 0)
    w_text = (rr < lt - 1).astype(f32)                             # text targets
    loss_t = jnp.sum(nll * w_text, keepdims=True)                  # per-batch sum
    loss_i = jnp.sum(nll * (1.0 - w_text), keepdims=True)

    loss_t_ref[...] = jnp.broadcast_to(loss_t, loss_t_ref.shape)
    loss_i_ref[...] = jnp.broadcast_to(loss_i, loss_i_ref.shape)


# ----------------------------------------------------------------------------
# Offline parameter packing (done once, outside the forward)
# ----------------------------------------------------------------------------
def pack_params(params):
    vae, gpt = params["vae"], params["gpt"]
    E = N_EMBD

    w = jnp.zeros((_W_ROWS, 128), jnp.float32)
    v = jnp.zeros((_V_ROWS, 128), jnp.float32)

    for l, blk in enumerate(gpt["blocks"]):
        r = l * _W_LAYER_ROWS
        w = w.at[r:r + E, 0:3 * E].set(blk["qkv_w"])
        w = w.at[r:r + E, 3 * E:4 * E].set(blk["proj_w"])
        w = w.at[r + E:r + 2 * E, :].set(blk["fc_w"])
        w = w.at[r + 2 * E:r + 3 * E, :].set(blk["fc_proj_w"].T)

        rv = l * _V_LAYER_ROWS
        v = v.at[rv, 0:E].set(blk["ln1_g"].reshape(-1))
        v = v.at[rv, E:2 * E].set(blk["ln1_b"].reshape(-1))
        v = v.at[rv, 2 * E:3 * E].set(blk["ln2_g"].reshape(-1))
        v = v.at[rv, 3 * E:4 * E].set(blk["ln2_b"].reshape(-1))
        v = v.at[rv + 1, 0:3 * E].set(blk["qkv_b"])
        v = v.at[rv + 1, 3 * E:4 * E].set(blk["proj_b"])
        v = v.at[rv + 2, :].set(blk["fc_b"])
        v = v.at[rv + 3, 0:E].set(blk["fc_proj_b"])

    # combined token embedding table: rows [0,32)=text, [32,48)=image, pad->128
    tok = jnp.concatenate([gpt["text_tok_emb"], gpt["image_tok_emb"]], axis=0)
    tok = jnp.pad(tok, ((0, VOCAB_PAD - VOCAB), (0, 0)))           # (128, E)
    w = w.at[_W_EMB_ROW:_W_EMB_ROW + E, :].set(tok.T)
    w = w.at[_W_HEAD_ROW:_W_HEAD_ROW + E, 0:VOCAB].set(gpt["head_w"])

    v = v.at[_V_HEADB_ROW, 0:VOCAB].set(gpt["head_b"])
    v = v.at[_V_LNF_ROW, 0:E].set(gpt["ln_f_g"].reshape(-1))
    v = v.at[_V_LNF_ROW, E:2 * E].set(gpt["ln_f_b"].reshape(-1))
    pos = jnp.concatenate([gpt["text_pos_emb"], gpt["image_pos_emb"]], axis=0)
    v = v.at[_V_POS_ROW:_V_POS_ROW + SEQ_LEN, 0:E].set(pos)

    enc_w2d = vae["enc_w"].reshape(LATENT_DIM, -1).T               # (CPP, D)
    v = v.at[_V_ENCW_ROW:_V_ENCW_ROW + CPP, 0:LATENT_DIM].set(enc_w2d)
    v = v.at[_V_ENCB_ROW, 0:LATENT_DIM].set(vae["enc_b"])
    e2 = jnp.sum(vae["codebook"] ** 2, axis=-1)                    # (K,)
    v = v.at[_V_ENCB_ROW,
             LATENT_DIM:LATENT_DIM + IMAGE_VOCAB_SIZE].set(e2)
    v = v.at[_V_CB_ROW:_V_CB_ROW + IMAGE_VOCAB_SIZE,
             0:LATENT_DIM].set(vae["codebook"])

    return dict(slab_w=w.astype(jnp.bfloat16), slab_v=v)


# ----------------------------------------------------------------------------
# Wrapper: DallE.forward
# ----------------------------------------------------------------------------
@functools.partial(jax.jit, static_argnames=("training",))
def dalle_forward(packed, im, text, training=True):
    b, c, h, w = im.shape
    hh, ww = h // PATCH, w // PATCH
    lt, li, seq = MAX_TEXT_LEN, LI, SEQ_LEN

    # im2col for the stride-PATCH encoder conv (NCHW)
    patches = im.reshape(b, c, hh, PATCH, ww, PATCH)
    patches = patches.transpose(0, 2, 4, 1, 3, 5).reshape(b * hh * ww, CPP)
    text_col = text.astype(jnp.int32).reshape(b * lt, 1)

    out_shapes = (
        jax.ShapeDtypeStruct((b * seq, VOCAB_PAD), jnp.float32),
        jax.ShapeDtypeStruct((b * 8, 128), jnp.float32),
        jax.ShapeDtypeStruct((b * 8, 128), jnp.float32),
    )
    cost = pl.CostEstimate(flops=int(4e6) * b, transcendentals=20_000 * b,
                           bytes_accessed=200_000 + 60_000 * b)

    logits_pad, lt_tiles, li_tiles = pl.pallas_call(
        _dalle_kernel,
        grid=(b,),
        in_specs=[
            pl.BlockSpec((li, CPP), lambda i: (i, 0)),          # per-batch patches
            pl.BlockSpec((lt, 1), lambda i: (i, 0)),            # per-batch text ids
            pl.BlockSpec((_W_ROWS, 128), lambda i: (0, 0)),     # bf16 weight slab
            pl.BlockSpec((_V_ROWS, 128), lambda i: (0, 0)),     # f32 vector slab
        ],
        out_specs=(
            pl.BlockSpec((seq, VOCAB_PAD), lambda i: (i, 0)),
            pl.BlockSpec((8, 128), lambda i: (i, 0)),
            pl.BlockSpec((8, 128), lambda i: (i, 0)),
        ),
        out_shape=out_shapes,
        compiler_params=pltpu.CompilerParams(
            dimension_semantics=("parallel",)),
        cost_estimate=cost,
    )(patches, text_col, packed["slab_w"], packed["slab_v"])

    logits = logits_pad[:, :VOCAB].reshape(b, seq, VOCAB)
    if training:
        loss_text = jnp.sum(lt_tiles.reshape(b, 8, 128)[:, 0, 0]) / (b * (lt - 1))
        loss_image = jnp.sum(li_tiles.reshape(b, 8, 128)[:, 0, 0]) / (b * li)
        return logits, loss_text, loss_image
    return logits, None, None


# ----------------------------------------------------------------------------
# Deterministic parameter init
# ----------------------------------------------------------------------------
def init_params(key):
    keys = iter(jax.random.split(key, 64))

    def nrm(shape, scale=0.02):
        return scale * jax.random.normal(next(keys), shape, jnp.float32)

    vae = dict(
        enc_w=nrm((LATENT_DIM, IN_CHANNELS, PATCH, PATCH), 0.1),
        enc_b=jnp.zeros((LATENT_DIM,), jnp.float32),
        codebook=nrm((IMAGE_VOCAB_SIZE, LATENT_DIM), 1.0),
    )
    blocks = []
    for _ in range(N_LAYER):
        blocks.append(dict(
            ln1_g=jnp.ones((1, N_EMBD), jnp.float32), ln1_b=jnp.zeros((1, N_EMBD), jnp.float32),
            qkv_w=nrm((N_EMBD, 3 * N_EMBD)), qkv_b=jnp.zeros((3 * N_EMBD,), jnp.float32),
            proj_w=nrm((N_EMBD, N_EMBD)), proj_b=jnp.zeros((N_EMBD,), jnp.float32),
            ln2_g=jnp.ones((1, N_EMBD), jnp.float32), ln2_b=jnp.zeros((1, N_EMBD), jnp.float32),
            fc_w=nrm((N_EMBD, 4 * N_EMBD)), fc_b=jnp.zeros((4 * N_EMBD,), jnp.float32),
            fc_proj_w=nrm((4 * N_EMBD, N_EMBD)), fc_proj_b=jnp.zeros((N_EMBD,), jnp.float32),
        ))
    gpt = dict(
        text_tok_emb=nrm((NUM_WORDS, N_EMBD)),
        image_tok_emb=nrm((IMAGE_VOCAB_SIZE, N_EMBD)),
        text_pos_emb=nrm((MAX_TEXT_LEN, N_EMBD)),
        image_pos_emb=nrm((IMAGE_SIZE * IMAGE_SIZE, N_EMBD)),
        blocks=blocks,
        ln_f_g=jnp.ones((1, N_EMBD), jnp.float32), ln_f_b=jnp.zeros((1, N_EMBD), jnp.float32),
        head_w=nrm((N_EMBD, VOCAB)), head_b=jnp.zeros((VOCAB,), jnp.float32),
    )
    return dict(vae=vae, gpt=gpt)


if __name__ == "__main__":
    key = jax.random.PRNGKey(0)
    pkey, ikey, tkey = jax.random.split(key, 3)
    params = init_params(pkey)
    packed = pack_params(params)     # one-time parameter packing (2 slabs)

    im = jax.random.normal(
        ikey, (2, IN_CHANNELS, IMAGE_SIZE * PATCH, IMAGE_SIZE * PATCH), jnp.float32)
    text = jax.random.randint(tkey, (2, MAX_TEXT_LEN), 0, NUM_WORDS, dtype=jnp.int32)

    logits, loss_text, loss_image = dalle_forward(packed, im, text)
    jax.block_until_ready((logits, loss_text, loss_image))

    assert logits.shape == (2, SEQ_LEN, VOCAB)
    assert loss_text.shape == () and loss_image.shape == ()
    print("KERNEL_OK")
</pallas_src>

<mosaic_0001>
module attributes {stable_mosaic.version = 11 : i64} {
  func.func @_dalle_kernel(%arg0: i32, %arg1: memref<16x48xf32, #tpu.memory_space<vmem>>, %arg2: memref<8x1xi32, #tpu.memory_space<vmem>>, %arg3: memref<256x128xbf16, #tpu.memory_space<vmem>>, %arg4: memref<104x128xf32, #tpu.memory_space<vmem>>, %arg5: memref<24x128xf32, #tpu.memory_space<vmem>>, %arg6: memref<8x128xf32, #tpu.memory_space<vmem>>, %arg7: memref<8x128xf32, #tpu.memory_space<vmem>>) attributes {dimension_semantics = [#tpu.dimension_semantics<parallel>], iteration_bounds = array<i64: 2>, scalar_prefetch = 0 : i64, scratch_operands = 0 : i64, tpu.core_type = #tpu.core_type<tc>, window_params = [{transform_indices = @transform_0, window_bounds = array<i64: 16, 48>}, {transform_indices = @transform_1, window_bounds = array<i64: 8, 1>}, {pipeline_mode = #tpu.pipeline_mode<synchronous>, transform_indices = @transform_2, window_bounds = array<i64: 256, 128>}, {pipeline_mode = #tpu.pipeline_mode<synchronous>, transform_indices = @transform_3, window_bounds = array<i64: 104, 128>}, {transform_indices = @transform_4, window_bounds = array<i64: 24, 128>}, {transform_indices = @transform_5, window_bounds = array<i64: 8, 128>}, {transform_indices = @transform_6, window_bounds = array<i64: 8, 128>}]} {
    %c0 = arith.constant 0 : index
    %c0_0 = arith.constant 0 : index
    %0 = vector.load %arg1[%c0, %c0_0] : memref<16x48xf32, #tpu.memory_space<vmem>>, vector<16x48xf32>
    %c34 = arith.constant 34 : index
    %c0_1 = arith.constant 0 : index
    %1 = vector.load %arg4[%c34, %c0_1] : memref<104x128xf32, #tpu.memory_space<vmem>>, vector<48x16xf32>
    %c82 = arith.constant 82 : index
    %c0_2 = arith.constant 0 : index
    %2 = vector.load %arg4[%c82, %c0_2] : memref<104x128xf32, #tpu.memory_space<vmem>>, vector<1x16xf32>
    %c82_3 = arith.constant 82 : index
    %c16 = arith.constant 16 : index
    %3 = vector.load %arg4[%c82_3, %c16] : memref<104x128xf32, #tpu.memory_space<vmem>>, vector<1x16xf32>
    %c83 = arith.constant 83 : index
    %c0_4 = arith.constant 0 : index
    %4 = vector.load %arg4[%c83, %c0_4] : memref<104x128xf32, #tpu.memory_space<vmem>>, vector<16x16xf32>
    %cst = arith.constant dense<0.000000e+00> : vector<16x16xf32>
    %5 = tpu.matmul %0, %1, %cst {dimension_numbers = #tpu.dot_dimension_numbers<[1], [0], [0], [1], [0, 0, 1, 1], [], []>} : vector<16x48xf32>, vector<48x16xf32>, vector<16x16xf32> -> vector<16x16xf32>
    %6 = vector.broadcast %2 : vector<1x16xf32> to vector<16x16xf32>
    %7 = arith.addf %5, %6 : vector<16x16xf32>
    %cst_5 = arith.constant dense<0.000000e+00> : vector<16x16xf32>
    %8 = tpu.matmul %7, %4, %cst_5 {dimension_numbers = #tpu.dot_dimension_numbers<[1], [1], [0], [0], [0, 0, 1, 0], [], []>} : vector<16x16xf32>, vector<16x16xf32>, vector<16x16xf32> -> vector<16x16xf32>
    %cst_6 = arith.constant 2.000000e+00 : f32
    %9 = vector.broadcast %cst_6 : f32 to vector<16x16xf32>
    %10 = arith.mulf %9, %8 : vector<16x16xf32>
    %11 = vector.broadcast %3 : vector<1x16xf32> to vector<16x16xf32>
    %12 = arith.subf %11, %10 : vector<16x16xf32>
    %cst_7 = arith.constant dense<0x7F800000> : vector<16xf32>
    %13 = vector.multi_reduction <minimumf>, %12, %cst_7 [1] : vector<16x16xf32> to vector<16xf32>
    %14 = vector.shape_cast %13 : vector<16xf32> to vector<16x1xf32>
    %15 = tpu.iota {dimensions = array<i32: 1>} : vector<16x16xi32>
    %16 = vector.broadcast %14 : vector<16x1xf32> to vector<16x16xf32>
    %17 = arith.cmpf ole, %12, %16 : vector<16x16xf32>
    %c16_i32 = arith.constant 16 : i32
    %18 = vector.broadcast %c16_i32 : i32 to vector<16x16xi32>
    %19 = arith.select %17, %15, %18 : vector<16x16xi1>, vector<16x16xi32>
    %cst_8 = arith.constant dense<2147483647> : vector<16xi32>
    %20 = vector.multi_reduction <minsi>, %19, %cst_8 [1] : vector<16x16xi32> to vector<16xi32>
    %21 = vector.shape_cast %20 : vector<16xi32> to vector<16x1xi32>
    %c0_9 = arith.constant 0 : index
    %c0_10 = arith.constant 0 : index
    %22 = vector.load %arg2[%c0_9, %c0_10] : memref<8x1xi32, #tpu.memory_space<vmem>>, vector<8x1xi32>
    %c32_i32 = arith.constant 32 : i32
    %23 = vector.broadcast %c32_i32 : i32 to vector<16x1xi32>
    %24 = arith.addi %21, %23 : vector<16x1xi32>
    %25 = tpu.concatenate %22, %24 in 0 : vector<8x1xi32>, vector<16x1xi32> -> vector<24x1xi32>
    %26 = tpu.iota {dimensions = array<i32: 1>} : vector<24x128xi32>
    %27 = vector.broadcast %25 : vector<24x1xi32> to vector<24x128xi32>
    %28 = arith.cmpi eq, %26, %27 : vector<24x128xi32>
    %29 = arith.extui %28 : vector<24x128xi1> to vector<24x128xi32>
    %30 = arith.sitofp %29 : vector<24x128xi32> to vector<24x128xf32>
    %c192 = arith.constant 192 : index
    %c0_11 = arith.constant 0 : index
    %31 = vector.load %arg3[%c192, %c0_11] : memref<256x128xbf16, #tpu.memory_space<vmem>>, vector<32x128xbf16>
    %c10 = arith.constant 10 : index
    %c0_12 = arith.constant 0 : index
    %32 = vector.load %arg4[%c10, %c0_12] : memref<104x128xf32, #tpu.memory_space<vmem>>, vector<24x32xf32>
    %33 = arith.truncf %30 : vector<24x128xf32> to vector<24x128xbf16>
    %cst_13 = arith.constant dense<0.000000e+00> : vector<24x32xf32>
    %34 = tpu.matmul %33, %31, %cst_13 {dimension_numbers = #tpu.dot_dimension_numbers<[1], [1], [0], [0], [0, 0, 1, 0], [], []>} : vector<24x128xbf16>, vector<32x128xbf16>, vector<24x32xf32> -> vector<24x32xf32>
    %35 = arith.addf %34, %32 : vector<24x32xf32>
    %36 = tpu.iota {dimensions = array<i32: 0>} : vector<24x24xi32>
    %37 = tpu.iota {dimensions = array<i32: 1>} : vector<24x24xi32>
    %38 = arith.cmpi sle, %37, %36 : vector<24x24xi32>
    %c0_14 = arith.constant 0 : index
    %c0_15 = arith.constant 0 : index
    %39 = vector.load %arg3[%c0_14, %c0_15] : memref<256x128xbf16, #tpu.memory_space<vmem>>, vector<32x96xbf16>
    %c0_16 = arith.constant 0 : index
    %c96 = arith.constant 96 : index
    %40 = vector.load %arg3[%c0_16, %c96] : memref<256x128xbf16, #tpu.memory_space<vmem>>, vector<32x32xbf16>
    %c32 = arith.constant 32 : index
    %c0_17 = arith.constant 0 : index
    %41 = vector.load %arg3[%c32, %c0_17] : memref<256x128xbf16, #tpu.memory_space<vmem>>, vector<32x128xbf16>
    %c64 = arith.constant 64 : index
    %c0_18 = arith.constant 0 : index
    %42 = vector.load %arg3[%c64, %c0_18] : memref<256x128xbf16, #tpu.memory_space<vmem>>, vector<32x128xbf16>
    %c0_19 = arith.constant 0 : index
    %c0_20 = arith.constant 0 : index
    %43 = vector.load %arg4[%c0_19, %c0_20] : memref<104x128xf32, #tpu.memory_space<vmem>>, vector<1x32xf32>
    %c0_21 = arith.constant 0 : index
    %c32_22 = arith.constant 32 : index
    %44 = vector.load %arg4[%c0_21, %c32_22] : memref<104x128xf32, #tpu.memory_space<vmem>>, vector<1x32xf32>
    %c0_23 = arith.constant 0 : index
    %c64_24 = arith.constant 64 : index
    %45 = vector.load %arg4[%c0_23, %c64_24] : memref<104x128xf32, #tpu.memory_space<vmem>>, vector<1x32xf32>
    %c0_25 = arith.constant 0 : index
    %c96_26 = arith.constant 96 : index
    %46 = vector.load %arg4[%c0_25, %c96_26] : memref<104x128xf32, #tpu.memory_space<vmem>>, vector<1x32xf32>
    %c1 = arith.constant 1 : index
    %c0_27 = arith.constant 0 : index
    %47 = vector.load %arg4[%c1, %c0_27] : memref<104x128xf32, #tpu.memory_space<vmem>>, vector<1x96xf32>
    %c1_28 = arith.constant 1 : index
    %c96_29 = arith.constant 96 : index
    %48 = vector.load %arg4[%c1_28, %c96_29] : memref<104x128xf32, #tpu.memory_space<vmem>>, vector<1x32xf32>
    %c2 = arith.constant 2 : index
    %c0_30 = arith.constant 0 : index
    %49 = vector.load %arg4[%c2, %c0_30] : memref<104x128xf32, #tpu.memory_space<vmem>>, vector<1x128xf32>
    %c3 = arith.constant 3 : index
    %c0_31 = arith.constant 0 : index
    %50 = vector.load %arg4[%c3, %c0_31] : memref<104x128xf32, #tpu.memory_space<vmem>>, vector<1x32xf32>
    %cst_32 = arith.constant dense<0.000000e+00> : vector<24xf32>
    %51 = vector.multi_reduction <add>, %35, %cst_32 [1] : vector<24x32xf32> to vector<24xf32>
    %52 = vector.shape_cast %51 : vector<24xf32> to vector<24x1xf32>
    %cst_33 = arith.constant 3.200000e+01 : f32
    %53 = vector.broadcast %cst_33 : f32 to vector<24x1xf32>
    %54 = arith.divf %52, %53 : vector<24x1xf32>
    %55 = vector.broadcast %54 : vector<24x1xf32> to vector<24x32xf32>
    %56 = arith.subf %35, %55 : vector<24x32xf32>
    %57 = arith.mulf %56, %56 : vector<24x32xf32>
    %cst_34 = arith.constant dense<0.000000e+00> : vector<24xf32>
    %58 = vector.multi_reduction <add>, %57, %cst_34 [1] : vector<24x32xf32> to vector<24xf32>
    %59 = vector.shape_cast %58 : vector<24xf32> to vector<24x1xf32>
    %cst_35 = arith.constant 3.200000e+01 : f32
    %60 = vector.broadcast %cst_35 : f32 to vector<24x1xf32>
    %61 = arith.divf %59, %60 : vector<24x1xf32>
    %62 = vector.broadcast %54 : vector<24x1xf32> to vector<24x32xf32>
    %63 = arith.subf %35, %62 : vector<24x32xf32>
    %cst_36 = arith.constant 9.99999974E-6 : f32
    %64 = vector.broadcast %cst_36 : f32 to vector<24x1xf32>
    %65 = arith.addf %61, %64 : vector<24x1xf32>
    %66 = math.rsqrt %65 : vector<24x1xf32>
    %67 = vector.broadcast %66 : vector<24x1xf32> to vector<24x32xf32>
    %68 = arith.mulf %63, %67 : vector<24x32xf32>
    %69 = vector.broadcast %43 : vector<1x32xf32> to vector<24x32xf32>
    %70 = arith.mulf %68, %69 : vector<24x32xf32>
    %71 = vector.broadcast %44 : vector<1x32xf32> to vector<24x32xf32>
    %72 = arith.addf %70, %71 : vector<24x32xf32>
    %73 = arith.truncf %72 : vector<24x32xf32> to vector<24x32xbf16>
    %cst_37 = arith.constant dense<0.000000e+00> : vector<24x96xf32>
    %74 = tpu.matmul %73, %39, %cst_37 {dimension_numbers = #tpu.dot_dimension_numbers<[1], [0], [0], [1], [0, 0, 1, 1], [], []>} : vector<24x32xbf16>, vector<32x96xbf16>, vector<24x96xf32> -> vector<24x96xf32>
    %75 = vector.broadcast %47 : vector<1x96xf32> to vector<24x96xf32>
    %76 = arith.addf %74, %75 : vector<24x96xf32>
    %77 = vector.extract_strided_slice %76 {offsets = [0, 0], sizes = [24, 16], strides = [1, 1]} : vector<24x96xf32> to vector<24x16xf32>
    %78 = arith.truncf %77 : vector<24x16xf32> to vector<24x16xbf16>
    %79 = vector.extract_strided_slice %76 {offsets = [0, 32], sizes = [24, 16], strides = [1, 1]} : vector<24x96xf32> to vector<24x16xf32>
    %80 = arith.truncf %79 : vector<24x16xf32> to vector<24x16xbf16>
    %81 = vector.extract_strided_slice %76 {offsets = [0, 64], sizes = [24, 16], strides = [1, 1]} : vector<24x96xf32> to vector<24x16xf32>
    %82 = arith.truncf %81 : vector<24x16xf32> to vector<24x16xbf16>
    %cst_38 = arith.constant dense<0.000000e+00> : vector<24x24xf32>
    %83 = tpu.matmul %78, %80, %cst_38 {dimension_numbers = #tpu.dot_dimension_numbers<[1], [1], [0], [0], [0, 0, 1, 0], [], []>} : vector<24x16xbf16>, vector<24x16xbf16>, vector<24x24xf32> -> vector<24x24xf32>
    %cst_39 = arith.constant 2.500000e-01 : f32
    %84 = vector.broadcast %cst_39 : f32 to vector<24x24xf32>
    %85 = arith.mulf %83, %84 : vector<24x24xf32>
    %cst_40 = arith.constant -1.000000e+30 : f32
    %86 = vector.broadcast %cst_40 : f32 to vector<24x24xf32>
    %87 = arith.select %38, %85, %86 : vector<24x24xi1>, vector<24x24xf32>
    %cst_41 = arith.constant dense<0xFF800000> : vector<24xf32>
    %88 = vector.multi_reduction <maximumf>, %87, %cst_41 [1] : vector<24x24xf32> to vector<24xf32>
    %89 = vector.shape_cast %88 : vector<24xf32> to vector<24x1xf32>
    %90 = vector.broadcast %89 : vector<24x1xf32> to vector<24x24xf32>
    %91 = arith.subf %87, %90 : vector<24x24xf32>
    %92 = math.exp %91 : vector<24x24xf32>
    %cst_42 = arith.constant dense<0.000000e+00> : vector<24xf32>
    %93 = vector.multi_reduction <add>, %92, %cst_42 [1] : vector<24x24xf32> to vector<24xf32>
    %94 = vector.shape_cast %93 : vector<24xf32> to vector<24x1xf32>
    %95 = tpu.reciprocal %94 {approx = true} : vector<24x1xf32> -> vector<24x1xf32>
    %96 = vector.broadcast %95 : vector<24x1xf32> to vector<24x24xf32>
    %97 = arith.mulf %92, %96 : vector<24x24xf32>
    %98 = arith.truncf %97 : vector<24x24xf32> to vector<24x24xbf16>
    %cst_43 = arith.constant dense<0.000000e+00> : vector<24x16xf32>
    %99 = tpu.matmul %98, %82, %cst_43 {dimension_numbers = #tpu.dot_dimension_numbers<[1], [0], [0], [1], [0, 0, 1, 1], [], []>} : vector<24x24xbf16>, vector<24x16xbf16>, vector<24x16xf32> -> vector<24x16xf32>
    %100 = vector.extract_strided_slice %76 {offsets = [0, 16], sizes = [24, 16], strides = [1, 1]} : vector<24x96xf32> to vector<24x16xf32>
    %101 = arith.truncf %100 : vector<24x16xf32> to vector<24x16xbf16>
    %102 = vector.extract_strided_slice %76 {offsets = [0, 48], sizes = [24, 16], strides = [1, 1]} : vector<24x96xf32> to vector<24x16xf32>
    %103 = arith.truncf %102 : vector<24x16xf32> to vector<24x16xbf16>
    %104 = vector.extract_strided_slice %76 {offsets = [0, 80], sizes = [24, 16], strides = [1, 1]} : vector<24x96xf32> to vector<24x16xf32>
    %105 = arith.truncf %104 : vector<24x16xf32> to vector<24x16xbf16>
    %cst_44 = arith.constant dense<0.000000e+00> : vector<24x24xf32>
    %106 = tpu.matmul %101, %103, %cst_44 {dimension_numbers = #tpu.dot_dimension_numbers<[1], [1], [0], [0], [0, 0, 1, 0], [], []>} : vector<24x16xbf16>, vector<24x16xbf16>, vector<24x24xf32> -> vector<24x24xf32>
    %cst_45 = arith.constant 2.500000e-01 : f32
    %107 = vector.broadcast %cst_45 : f32 to vector<24x24xf32>
    %108 = arith.mulf %106, %107 : vector<24x24xf32>
    %cst_46 = arith.constant -1.000000e+30 : f32
    %109 = vector.broadcast %cst_46 : f32 to vector<24x24xf32>
    %110 = arith.select %38, %108, %109 : vector<24x24xi1>, vector<24x24xf32>
    %cst_47 = arith.constant dense<0xFF800000> : vector<24xf32>
    %111 = vector.multi_reduction <maximumf>, %110, %cst_47 [1] : vector<24x24xf32> to vector<24xf32>
    %112 = vector.shape_cast %111 : vector<24xf32> to vector<24x1xf32>
    %113 = vector.broadcast %112 : vector<24x1xf32> to vector<24x24xf32>
    %114 = arith.subf %110, %113 : vector<24x24xf32>
    %115 = math.exp %114 : vector<24x24xf32>
    %cst_48 = arith.constant dense<0.000000e+00> : vector<24xf32>
    %116 = vector.multi_reduction <add>, %115, %cst_48 [1] : vector<24x24xf32> to vector<24xf32>
    %117 = vector.shape_cast %116 : vector<24xf32> to vector<24x1xf32>
    %118 = tpu.reciprocal %117 {approx = true} : vector<24x1xf32> -> vector<24x1xf32>
    %119 = vector.broadcast %118 : vector<24x1xf32> to vector<24x24xf32>
    %120 = arith.mulf %115, %119 : vector<24x24xf32>
    %121 = arith.truncf %120 : vector<24x24xf32> to vector<24x24xbf16>
    %cst_49 = arith.constant dense<0.000000e+00> : vector<24x16xf32>
    %122 = tpu.matmul %121, %105, %cst_49 {dimension_numbers = #tpu.dot_dimension_numbers<[1], [0], [0], [1], [0, 0, 1, 1], [], []>} : vector<24x24xbf16>, vector<24x16xbf16>, vector<24x16xf32> -> vector<24x16xf32>
    %123 = tpu.concatenate %99, %122 in 1 : vector<24x16xf32>, vector<24x16xf32> -> vector<24x32xf32>
    %124 = arith.truncf %123 : vector<24x32xf32> to vector<24x32xbf16>
    %cst_50 = arith.constant dense<0.000000e+00> : vector<24x32xf32>
    %125 = tpu.matmul %124, %40, %cst_50 {dimension_numbers = #tpu.dot_dimension_numbers<[1], [0], [0], [1], [0, 0, 1, 1], [], []>} : vector<24x32xbf16>, vector<32x32xbf16>, vector<24x32xf32> -> vector<24x32xf32>
    %126 = arith.addf %35, %125 : vector<24x32xf32>
    %127 = vector.broadcast %48 : vector<1x32xf32> to vector<24x32xf32>
    %128 = arith.addf %126, %127 : vector<24x32xf32>
    %cst_51 = arith.constant dense<0.000000e+00> : vector<24xf32>
    %129 = vector.multi_reduction <add>, %128, %cst_51 [1] : vector<24x32xf32> to vector<24xf32>
    %130 = vector.shape_cast %129 : vector<24xf32> to vector<24x1xf32>
    %cst_52 = arith.constant 3.200000e+01 : f32
    %131 = vector.broadcast %cst_52 : f32 to vector<24x1xf32>
    %132 = arith.divf %130, %131 : vector<24x1xf32>
    %133 = vector.broadcast %132 : vector<24x1xf32> to vector<24x32xf32>
    %134 = arith.subf %128, %133 : vector<24x32xf32>
    %135 = arith.mulf %134, %134 : vector<24x32xf32>
    %cst_53 = arith.constant dense<0.000000e+00> : vector<24xf32>
    %136 = vector.multi_reduction <add>, %135, %cst_53 [1] : vector<24x32xf32> to vector<24xf32>
    %137 = vector.shape_cast %136 : vector<24xf32> to vector<24x1xf32>
    %cst_54 = arith.constant 3.200000e+01 : f32
    %138 = vector.broadcast %cst_54 : f32 to vector<24x1xf32>
    %139 = arith.divf %137, %138 : vector<24x1xf32>
    %140 = vector.broadcast %132 : vector<24x1xf32> to vector<24x32xf32>
    %141 = arith.subf %128, %140 : vector<24x32xf32>
    %cst_55 = arith.constant 9.99999974E-6 : f32
    %142 = vector.broadcast %cst_55 : f32 to vector<24x1xf32>
    %143 = arith.addf %139, %142 : vector<24x1xf32>
    %144 = math.rsqrt %143 : vector<24x1xf32>
    %145 = vector.broadcast %144 : vector<24x1xf32> to vector<24x32xf32>
    %146 = arith.mulf %141, %145 : vector<24x32xf32>
    %147 = vector.broadcast %45 : vector<1x32xf32> to vector<24x32xf32>
    %148 = arith.mulf %146, %147 : vector<24x32xf32>
    %149 = vector.broadcast %46 : vector<1x32xf32> to vector<24x32xf32>
    %150 = arith.addf %148, %149 : vector<24x32xf32>
    %151 = arith.truncf %150 : vector<24x32xf32> to vector<24x32xbf16>
    %cst_56 = arith.constant dense<0.000000e+00> : vector<24x128xf32>
    %152 = tpu.matmul %151, %41, %cst_56 {dimension_numbers = #tpu.dot_dimension_numbers<[1], [0], [0], [1], [0, 0, 1, 1], [], []>} : vector<24x32xbf16>, vector<32x128xbf16>, vector<24x128xf32> -> vector<24x128xf32>
    %153 = vector.broadcast %49 : vector<1x128xf32> to vector<24x128xf32>
    %154 = arith.addf %152, %153 : vector<24x128xf32>
    %155 = arith.mulf %154, %154 : vector<24x128xf32>
    %156 = arith.mulf %154, %155 : vector<24x128xf32>
    %cst_57 = arith.constant 4.471500e-02 : f32
    %157 = vector.broadcast %cst_57 : f32 to vector<24x128xf32>
    %158 = arith.mulf %157, %156 : vector<24x128xf32>
    %159 = arith.addf %154, %158 : vector<24x128xf32>
    %cst_58 = arith.constant 0.797884583 : f32
    %160 = vector.broadcast %cst_58 : f32 to vector<24x128xf32>
    %161 = arith.mulf %160, %159 : vector<24x128xf32>
    %162 = math.tanh %161 : vector<24x128xf32>
    %cst_59 = arith.constant 1.000000e+00 : f32
    %163 = vector.broadcast %cst_59 : f32 to vector<24x128xf32>
    %164 = arith.addf %163, %162 : vector<24x128xf32>
    %cst_60 = arith.constant 5.000000e-01 : f32
    %165 = vector.broadcast %cst_60 : f32 to vector<24x128xf32>
    %166 = arith.mulf %165, %164 : vector<24x128xf32>
    %167 = arith.mulf %154, %166 : vector<24x128xf32>
    %168 = arith.truncf %167 : vector<24x128xf32> to vector<24x128xbf16>
    %cst_61 = arith.constant dense<0.000000e+00> : vector<24x32xf32>
    %169 = tpu.matmul %168, %42, %cst_61 {dimension_numbers = #tpu.dot_dimension_numbers<[1], [1], [0], [0], [0, 0, 1, 0], [], []>} : vector<24x128xbf16>, vector<32x128xbf16>, vector<24x32xf32> -> vector<24x32xf32>
    %170 = vector.broadcast %50 : vector<1x32xf32> to vector<24x32xf32>
    %171 = arith.addf %169, %170 : vector<24x32xf32>
    %172 = arith.addf %128, %171 : vector<24x32xf32>
    %c96_62 = arith.constant 96 : index
    %c0_63 = arith.constant 0 : index
    %173 = vector.load %arg3[%c96_62, %c0_63] : memref<256x128xbf16, #tpu.memory_space<vmem>>, vector<32x96xbf16>
    %c96_64 = arith.constant 96 : index
    %c96_65 = arith.constant 96 : index
    %174 = vector.load %arg3[%c96_64, %c96_65] : memref<256x128xbf16, #tpu.memory_space<vmem>>, vector<32x32xbf16>
    %c128 = arith.constant 128 : index
    %c0_66 = arith.constant 0 : index
    %175 = vector.load %arg3[%c128, %c0_66] : memref<256x128xbf16, #tpu.memory_space<vmem>>, vector<32x128xbf16>
    %c160 = arith.constant 160 : index
    %c0_67 = arith.constant 0 : index
    %176 = vector.load %arg3[%c160, %c0_67] : memref<256x128xbf16, #tpu.memory_space<vmem>>, vector<32x128xbf16>
    %c4 = arith.constant 4 : index
    %c0_68 = arith.constant 0 : index
    %177 = vector.load %arg4[%c4, %c0_68] : memref<104x128xf32, #tpu.memory_space<vmem>>, vector<1x32xf32>
    %c4_69 = arith.constant 4 : index
    %c32_70 = arith.constant 32 : index
    %178 = vector.load %arg4[%c4_69, %c32_70] : memref<104x128xf32, #tpu.memory_space<vmem>>, vector<1x32xf32>
    %c4_71 = arith.constant 4 : index
    %c64_72 = arith.constant 64 : index
    %179 = vector.load %arg4[%c4_71, %c64_72] : memref<104x128xf32, #tpu.memory_space<vmem>>, vector<1x32xf32>
    %c4_73 = arith.constant 4 : index
    %c96_74 = arith.constant 96 : index
    %180 = vector.load %arg4[%c4_73, %c96_74] : memref<104x128xf32, #tpu.memory_space<vmem>>, vector<1x32xf32>
    %c5 = arith.constant 5 : index
    %c0_75 = arith.constant 0 : index
    %181 = vector.load %arg4[%c5, %c0_75] : memref<104x128xf32, #tpu.memory_space<vmem>>, vector<1x96xf32>
    %c5_76 = arith.constant 5 : index
    %c96_77 = arith.constant 96 : index
    %182 = vector.load %arg4[%c5_76, %c96_77] : memref<104x128xf32, #tpu.memory_space<vmem>>, vector<1x32xf32>
    %c6 = arith.constant 6 : index
    %c0_78 = arith.constant 0 : index
    %183 = vector.load %arg4[%c6, %c0_78] : memref<104x128xf32, #tpu.memory_space<vmem>>, vector<1x128xf32>
    %c7 = arith.constant 7 : index
    %c0_79 = arith.constant 0 : index
    %184 = vector.load %arg4[%c7, %c0_79] : memref<104x128xf32, #tpu.memory_space<vmem>>, vector<1x32xf32>
    %cst_80 = arith.constant dense<0.000000e+00> : vector<24xf32>
    %185 = vector.multi_reduction <add>, %172, %cst_80 [1] : vector<24x32xf32> to vector<24xf32>
    %186 = vector.shape_cast %185 : vector<24xf32> to vector<24x1xf32>
    %cst_81 = arith.constant 3.200000e+01 : f32
    %187 = vector.broadcast %cst_81 : f32 to vector<24x1xf32>
    %188 = arith.divf %186, %187 : vector<24x1xf32>
    %189 = vector.broadcast %188 : vector<24x1xf32> to vector<24x32xf32>
    %190 = arith.subf %172, %189 : vector<24x32xf32>
    %191 = arith.mulf %190, %190 : vector<24x32xf32>
    %cst_82 = arith.constant dense<0.000000e+00> : vector<24xf32>
    %192 = vector.multi_reduction <add>, %191, %cst_82 [1] : vector<24x32xf32> to vector<24xf32>
    %193 = vector.shape_cast %192 : vector<24xf32> to vector<24x1xf32>
    %cst_83 = arith.constant 3.200000e+01 : f32
    %194 = vector.broadcast %cst_83 : f32 to vector<24x1xf32>
    %195 = arith.divf %193, %194 : vector<24x1xf32>
    %196 = vector.broadcast %188 : vector<24x1xf32> to vector<24x32xf32>
    %197 = arith.subf %172, %196 : vector<24x32xf32>
    %cst_84 = arith.constant 9.99999974E-6 : f32
    %198 = vector.broadcast %cst_84 : f32 to vector<24x1xf32>
    %199 = arith.addf %195, %198 : vector<24x1xf32>
    %200 = math.rsqrt %199 : vector<24x1xf32>
    %201 = vector.broadcast %200 : vector<24x1xf32> to vector<24x32xf32>
    %202 = arith.mulf %197, %201 : vector<24x32xf32>
    %203 = vector.broadcast %177 : vector<1x32xf32> to vector<24x32xf32>
    %204 = arith.mulf %202, %203 : vector<24x32xf32>
    %205 = vector.broadcast %178 : vector<1x32xf32> to vector<24x32xf32>
    %206 = arith.addf %204, %205 : vector<24x32xf32>
    %207 = arith.truncf %206 : vector<24x32xf32> to vector<24x32xbf16>
    %cst_85 = arith.constant dense<0.000000e+00> : vector<24x96xf32>
    %208 = tpu.matmul %207, %173, %cst_85 {dimension_numbers = #tpu.dot_dimension_numbers<[1], [0], [0], [1], [0, 0, 1, 1], [], []>} : vector<24x32xbf16>, vector<32x96xbf16>, vector<24x96xf32> -> vector<24x96xf32>
    %209 = vector.broadcast %181 : vector<1x96xf32> to vector<24x96xf32>
    %210 = arith.addf %208, %209 : vector<24x96xf32>
    %211 = vector.extract_strided_slice %210 {offsets = [0, 0], sizes = [24, 16], strides = [1, 1]} : vector<24x96xf32> to vector<24x16xf32>
    %212 = arith.truncf %211 : vector<24x16xf32> to vector<24x16xbf16>
    %213 = vector.extract_strided_slice %210 {offsets = [0, 32], sizes = [24, 16], strides = [1, 1]} : vector<24x96xf32> to vector<24x16xf32>
    %214 = arith.truncf %213 : vector<24x16xf32> to vector<24x16xbf16>
    %215 = vector.extract_strided_slice %210 {offsets = [0, 64], sizes = [24, 16], strides = [1, 1]} : vector<24x96xf32> to vector<24x16xf32>
    %216 = arith.truncf %215 : vector<24x16xf32> to vector<24x16xbf16>
    %cst_86 = arith.constant dense<0.000000e+00> : vector<24x24xf32>
    %217 = tpu.matmul %212, %214, %cst_86 {dimension_numbers = #tpu.dot_dimension_numbers<[1], [1], [0], [0], [0, 0, 1, 0], [], []>} : vector<24x16xbf16>, vector<24x16xbf16>, vector<24x24xf32> -> vector<24x24xf32>
    %cst_87 = arith.constant 2.500000e-01 : f32
    %218 = vector.broadcast %cst_87 : f32 to vector<24x24xf32>
    %219 = arith.mulf %217, %218 : vector<24x24xf32>
    %cst_88 = arith.constant -1.000000e+30 : f32
    %220 = vector.broadcast %cst_88 : f32 to vector<24x24xf32>
    %221 = arith.select %38, %219, %220 : vector<24x24xi1>, vector<24x24xf32>
    %cst_89 = arith.constant dense<0xFF800000> : vector<24xf32>
    %222 = vector.multi_reduction <maximumf>, %221, %cst_89 [1] : vector<24x24xf32> to vector<24xf32>
    %223 = vector.shape_cast %222 : vector<24xf32> to vector<24x1xf32>
    %224 = vector.broadcast %223 : vector<24x1xf32> to vector<24x24xf32>
    %225 = arith.subf %221, %224 : vector<24x24xf32>
    %226 = math.exp %225 : vector<24x24xf32>
    %cst_90 = arith.constant dense<0.000000e+00> : vector<24xf32>
    %227 = vector.multi_reduction <add>, %226, %cst_90 [1] : vector<24x24xf32> to vector<24xf32>
    %228 = vector.shape_cast %227 : vector<24xf32> to vector<24x1xf32>
    %229 = tpu.reciprocal %228 {approx = true} : vector<24x1xf32> -> vector<24x1xf32>
    %230 = vector.broadcast %229 : vector<24x1xf32> to vector<24x24xf32>
    %231 = arith.mulf %226, %230 : vector<24x24xf32>
    %232 = arith.truncf %231 : vector<24x24xf32> to vector<24x24xbf16>
    %cst_91 = arith.constant dense<0.000000e+00> : vector<24x16xf32>
    %233 = tpu.matmul %232, %216, %cst_91 {dimension_numbers = #tpu.dot_dimension_numbers<[1], [0], [0], [1], [0, 0, 1, 1], [], []>} : vector<24x24xbf16>, vector<24x16xbf16>, vector<24x16xf32> -> vector<24x16xf32>
    %234 = vector.extract_strided_slice %210 {offsets = [0, 16], sizes = [24, 16], strides = [1, 1]} : vector<24x96xf32> to vector<24x16xf32>
    %235 = arith.truncf %234 : vector<24x16xf32> to vector<24x16xbf16>
    %236 = vector.extract_strided_slice %210 {offsets = [0, 48], sizes = [24, 16], strides = [1, 1]} : vector<24x96xf32> to vector<24x16xf32>
    %237 = arith.truncf %236 : vector<24x16xf32> to vector<24x16xbf16>
    %238 = vector.extract_strided_slice %210 {offsets = [0, 80], sizes = [24, 16], strides = [1, 1]} : vector<24x96xf32> to vector<24x16xf32>
    %239 = arith.truncf %238 : vector<24x16xf32> to vector<24x16xbf16>
    %cst_92 = arith.constant dense<0.000000e+00> : vector<24x24xf32>
    %240 = tpu.matmul %235, %237, %cst_92 {dimension_numbers = #tpu.dot_dimension_numbers<[1], [1], [0], [0], [0, 0, 1, 0], [], []>} : vector<24x16xbf16>, vector<24x16xbf16>, vector<24x24xf32> -> vector<24x24xf32>
    %cst_93 = arith.constant 2.500000e-01 : f32
    %241 = vector.broadcast %cst_93 : f32 to vector<24x24xf32>
    %242 = arith.mulf %240, %241 : vector<24x24xf32>
    %cst_94 = arith.constant -1.000000e+30 : f32
    %243 = vector.broadcast %cst_94 : f32 to vector<24x24xf32>
    %244 = arith.select %38, %242, %243 : vector<24x24xi1>, vector<24x24xf32>
    %cst_95 = arith.constant dense<0xFF800000> : vector<24xf32>
    %245 = vector.multi_reduction <maximumf>, %244, %cst_95 [1] : vector<24x24xf32> to vector<24xf32>
    %246 = vector.shape_cast %245 : vector<24xf32> to vector<24x1xf32>
    %247 = vector.broadcast %246 : vector<24x1xf32> to vector<24x24xf32>
    %248 = arith.subf %244, %247 : vector<24x24xf32>
    %249 = math.exp %248 : vector<24x24xf32>
    %cst_96 = arith.constant dense<0.000000e+00> : vector<24xf32>
    %250 = vector.multi_reduction <add>, %249, %cst_96 [1] : vector<24x24xf32> to vector<24xf32>
    %251 = vector.shape_cast %250 : vector<24xf32> to vector<24x1xf32>
    %252 = tpu.reciprocal %251 {approx = true} : vector<24x1xf32> -> vector<24x1xf32>
    %253 = vector.broadcast %252 : vector<24x1xf32> to vector<24x24xf32>
    %254 = arith.mulf %249, %253 : vector<24x24xf32>
    %255 = arith.truncf %254 : vector<24x24xf32> to vector<24x24xbf16>
    %cst_97 = arith.constant dense<0.000000e+00> : vector<24x16xf32>
    %256 = tpu.matmul %255, %239, %cst_97 {dimension_numbers = #tpu.dot_dimension_numbers<[1], [0], [0], [1], [0, 0, 1, 1], [], []>} : vector<24x24xbf16>, vector<24x16xbf16>, vector<24x16xf32> -> vector<24x16xf32>
    %257 = tpu.concatenate %233, %256 in 1 : vector<24x16xf32>, vector<24x16xf32> -> vector<24x32xf32>
    %258 = arith.truncf %257 : vector<24x32xf32> to vector<24x32xbf16>
    %cst_98 = arith.constant dense<0.000000e+00> : vector<24x32xf32>
    %259 = tpu.matmul %258, %174, %cst_98 {dimension_numbers = #tpu.dot_dimension_numbers<[1], [0], [0], [1], [0, 0, 1, 1], [], []>} : vector<24x32xbf16>, vector<32x32xbf16>, vector<24x32xf32> -> vector<24x32xf32>
    %260 = arith.addf %172, %259 : vector<24x32xf32>
    %261 = vector.broadcast %182 : vector<1x32xf32> to vector<24x32xf32>
    %262 = arith.addf %260, %261 : vector<24x32xf32>
    %cst_99 = arith.constant dense<0.000000e+00> : vector<24xf32>
    %263 = vector.multi_reduction <add>, %262, %cst_99 [1] : vector<24x32xf32> to vector<24xf32>
    %264 = vector.shape_cast %263 : vector<24xf32> to vector<24x1xf32>
    %cst_100 = arith.constant 3.200000e+01 : f32
    %265 = vector.broadcast %cst_100 : f32 to vector<24x1xf32>
    %266 = arith.divf %264, %265 : vector<24x1xf32>
    %267 = vector.broadcast %266 : vector<24x1xf32> to vector<24x32xf32>
    %268 = arith.subf %262, %267 : vector<24x32xf32>
    %269 = arith.mulf %268, %268 : vector<24x32xf32>
    %cst_101 = arith.constant dense<0.000000e+00> : vector<24xf32>
    %270 = vector.multi_reduction <add>, %269, %cst_101 [1] : vector<24x32xf32> to vector<24xf32>
    %271 = vector.shape_cast %270 : vector<24xf32> to vector<24x1xf32>
    %cst_102 = arith.constant 3.200000e+01 : f32
    %272 = vector.broadcast %cst_102 : f32 to vector<24x1xf32>
    %273 = arith.divf %271, %272 : vector<24x1xf32>
    %274 = vector.broadcast %266 : vector<24x1xf32> to vector<24x32xf32>
    %275 = arith.subf %262, %274 : vector<24x32xf32>
    %cst_103 = arith.constant 9.99999974E-6 : f32
    %276 = vector.broadcast %cst_103 : f32 to vector<24x1xf32>
    %277 = arith.addf %273, %276 : vector<24x1xf32>
    %278 = math.rsqrt %277 : vector<24x1xf32>
    %279 = vector.broadcast %278 : vector<24x1xf32> to vector<24x32xf32>
    %280 = arith.mulf %275, %279 : vector<24x32xf32>
    %281 = vector.broadcast %179 : vector<1x32xf32> to vector<24x32xf32>
    %282 = arith.mulf %280, %281 : vector<24x32xf32>
    %283 = vector.broadcast %180 : vector<1x32xf32> to vector<24x32xf32>
    %284 = arith.addf %282, %283 : vector<24x32xf32>
    %285 = arith.truncf %284 : vector<24x32xf32> to vector<24x32xbf16>
    %cst_104 = arith.constant dense<0.000000e+00> : vector<24x128xf32>
    %286 = tpu.matmul %285, %175, %cst_104 {dimension_numbers = #tpu.dot_dimension_numbers<[1], [0], [0], [1], [0, 0, 1, 1], [], []>} : vector<24x32xbf16>, vector<32x128xbf16>, vector<24x128xf32> -> vector<24x128xf32>
    %287 = vector.broadcast %183 : vector<1x128xf32> to vector<24x128xf32>
    %288 = arith.addf %286, %287 : vector<24x128xf32>
    %289 = arith.mulf %288, %288 : vector<24x128xf32>
    %290 = arith.mulf %288, %289 : vector<24x128xf32>
    %cst_105 = arith.constant 4.471500e-02 : f32
    %291 = vector.broadcast %cst_105 : f32 to vector<24x128xf32>
    %292 = arith.mulf %291, %290 : vector<24x128xf32>
    %293 = arith.addf %288, %292 : vector<24x128xf32>
    %cst_106 = arith.constant 0.797884583 : f32
    %294 = vector.broadcast %cst_106 : f32 to vector<24x128xf32>
    %295 = arith.mulf %294, %293 : vector<24x128xf32>
    %296 = math.tanh %295 : vector<24x128xf32>
    %cst_107 = arith.constant 1.000000e+00 : f32
    %297 = vector.broadcast %cst_107 : f32 to vector<24x128xf32>
    %298 = arith.addf %297, %296 : vector<24x128xf32>
    %cst_108 = arith.constant 5.000000e-01 : f32
    %299 = vector.broadcast %cst_108 : f32 to vector<24x128xf32>
    %300 = arith.mulf %299, %298 : vector<24x128xf32>
    %301 = arith.mulf %288, %300 : vector<24x128xf32>
    %302 = arith.truncf %301 : vector<24x128xf32> to vector<24x128xbf16>
    %cst_109 = arith.constant dense<0.000000e+00> : vector<24x32xf32>
    %303 = tpu.matmul %302, %176, %cst_109 {dimension_numbers = #tpu.dot_dimension_numbers<[1], [1], [0], [0], [0, 0, 1, 0], [], []>} : vector<24x128xbf16>, vector<32x128xbf16>, vector<24x32xf32> -> vector<24x32xf32>
    %304 = vector.broadcast %184 : vector<1x32xf32> to vector<24x32xf32>
    %305 = arith.addf %303, %304 : vector<24x32xf32>
    %306 = arith.addf %262, %305 : vector<24x32xf32>
    %c9 = arith.constant 9 : index
    %c0_110 = arith.constant 0 : index
    %307 = vector.load %arg4[%c9, %c0_110] : memref<104x128xf32, #tpu.memory_space<vmem>>, vector<1x32xf32>
    %c9_111 = arith.constant 9 : index
    %c32_112 = arith.constant 32 : index
    %308 = vector.load %arg4[%c9_111, %c32_112] : memref<104x128xf32, #tpu.memory_space<vmem>>, vector<1x32xf32>
    %c224 = arith.constant 224 : index
    %c0_113 = arith.constant 0 : index
    %309 = vector.load %arg3[%c224, %c0_113] : memref<256x128xbf16, #tpu.memory_space<vmem>>, vector<32x128xbf16>
    %c8 = arith.constant 8 : index
    %c0_114 = arith.constant 0 : index
    %310 = vector.load %arg4[%c8, %c0_114] : memref<104x128xf32, #tpu.memory_space<vmem>>, vector<1x128xf32>
    %cst_115 = arith.constant dense<0.000000e+00> : vector<24xf32>
    %311 = vector.multi_reduction <add>, %306, %cst_115 [1] : vector<24x32xf32> to vector<24xf32>
    %312 = vector.shape_cast %311 : vector<24xf32> to vector<24x1xf32>
    %cst_116 = arith.constant 3.200000e+01 : f32
    %313 = vector.broadcast %cst_116 : f32 to vector<24x1xf32>
    %314 = arith.divf %312, %313 : vector<24x1xf32>
    %315 = vector.broadcast %314 : vector<24x1xf32> to vector<24x32xf32>
    %316 = arith.subf %306, %315 : vector<24x32xf32>
    %317 = arith.mulf %316, %316 : vector<24x32xf32>
    %cst_117 = arith.constant dense<0.000000e+00> : vector<24xf32>
    %318 = vector.multi_reduction <add>, %317, %cst_117 [1] : vector<24x32xf32> to vector<24xf32>
    %319 = vector.shape_cast %318 : vector<24xf32> to vector<24x1xf32>
    %cst_118 = arith.constant 3.200000e+01 : f32
    %320 = vector.broadcast %cst_118 : f32 to vector<24x1xf32>
    %321 = arith.divf %319, %320 : vector<24x1xf32>
    %322 = vector.broadcast %314 : vector<24x1xf32> to vector<24x32xf32>
    %323 = arith.subf %306, %322 : vector<24x32xf32>
    %cst_119 = arith.constant 9.99999974E-6 : f32
    %324 = vector.broadcast %cst_119 : f32 to vector<24x1xf32>
    %325 = arith.addf %321, %324 : vector<24x1xf32>
    %326 = math.rsqrt %325 : vector<24x1xf32>
    %327 = vector.broadcast %326 : vector<24x1xf32> to vector<24x32xf32>
    %328 = arith.mulf %323, %327 : vector<24x32xf32>
    %329 = vector.broadcast %307 : vector<1x32xf32> to vector<24x32xf32>
    %330 = arith.mulf %328, %329 : vector<24x32xf32>
    %331 = vector.broadcast %308 : vector<1x32xf32> to vector<24x32xf32>
    %332 = arith.addf %330, %331 : vector<24x32xf32>
    %333 = arith.truncf %332 : vector<24x32xf32> to vector<24x32xbf16>
    %cst_120 = arith.constant dense<0.000000e+00> : vector<24x128xf32>
    %334 = tpu.matmul %333, %309, %cst_120 {dimension_numbers = #tpu.dot_dimension_numbers<[1], [0], [0], [1], [0, 0, 1, 1], [], []>} : vector<24x32xbf16>, vector<32x128xbf16>, vector<24x128xf32> -> vector<24x128xf32>
    %335 = vector.broadcast %310 : vector<1x128xf32> to vector<24x128xf32>
    %336 = arith.addf %334, %335 : vector<24x128xf32>
    %c0_121 = arith.constant 0 : index
    %c0_122 = arith.constant 0 : index
    %337 = vector.load %arg5[%c0_121, %c0_122] : memref<24x128xf32, #tpu.memory_space<vmem>>, vector<24x128xf32>
    tpu.vector_store %arg5[%c0_121, %c0_122], %336 {strides = array<i32>} : memref<24x128xf32, #tpu.memory_space<vmem>>, vector<24x128xf32>,
    %c48_i32 = arith.constant 48 : i32
    %338 = vector.broadcast %c48_i32 : i32 to vector<24x128xi32>
    %339 = arith.cmpi slt, %26, %338 : vector<24x128xi32>
    %cst_123 = arith.constant -1.000000e+30 : f32
    %340 = vector.broadcast %cst_123 : f32 to vector<24x128xf32>
    %341 = arith.select %339, %336, %340 : vector<24x128xi1>, vector<24x128xf32>
    %cst_124 = arith.constant dense<0xFF800000> : vector<24xf32>
    %342 = vector.multi_reduction <maximumf>, %341, %cst_124 [1] : vector<24x128xf32> to vector<24xf32>
    %343 = vector.shape_cast %342 : vector<24xf32> to vector<24x1xf32>
    %344 = vector.broadcast %343 : vector<24x1xf32> to vector<24x128xf32>
    %345 = arith.subf %341, %344 : vector<24x128xf32>
    %346 = math.exp %345 : vector<24x128xf32>
    %cst_125 = arith.constant dense<0.000000e+00> : vector<24xf32>
    %347 = vector.multi_reduction <add>, %346, %cst_125 [1] : vector<24x128xf32> to vector<24xf32>
    %348 = vector.shape_cast %347 : vector<24xf32> to vector<24x1xf32>
    %349 = math.log %348 : vector<24x1xf32>
    %350 = arith.addf %343, %349 : vector<24x1xf32>
    %351 = vector.extract_strided_slice %336 {offsets = [0, 0], sizes = [23, 128], strides = [1, 1]} : vector<24x128xf32> to vector<23x128xf32>
    %352 = vector.extract_strided_slice %30 {offsets = [1, 0], sizes = [23, 128], strides = [1, 1]} : vector<24x128xf32> to vector<23x128xf32>
    %353 = arith.mulf %351, %352 : vector<23x128xf32>
    %cst_126 = arith.constant dense<0.000000e+00> : vector<23xf32>
    %354 = vector.multi_reduction <add>, %353, %cst_126 [1] : vector<23x128xf32> to vector<23xf32>
    %355 = vector.shape_cast %354 : vector<23xf32> to vector<23x1xf32>
    %356 = vector.extract_strided_slice %350 {offsets = [0, 0], sizes = [23, 1], strides = [1, 1]} : vector<24x1xf32> to vector<23x1xf32>
    %357 = arith.subf %356, %355 : vector<23x1xf32>
    %358 = tpu.iota {dimensions = array<i32: 0>} : vector<23x1xi32>
    %c7_i32 = arith.constant 7 : i32
    %359 = vector.broadcast %c7_i32 : i32 to vector<23x1xi32>
    %360 = arith.cmpi slt, %358, %359 : vector<23x1xi32>
    %361 = arith.extui %360 : vector<23x1xi1> to vector<23x1xi32>
    %362 = arith.sitofp %361 : vector<23x1xi32> to vector<23x1xf32>
    %363 = arith.mulf %357, %362 : vector<23x1xf32>
    %364 = vector.shape_cast %363 : vector<23x1xf32> to vector<1x23x1xf32>
    %cst_127 = arith.constant dense<0.000000e+00> : vector<1xf32>
    %365 = vector.multi_reduction <add>, %364, %cst_127 [1, 2] : vector<1x23x1xf32> to vector<1xf32>
    %366 = vector.shape_cast %365 : vector<1xf32> to vector<1x1x1xf32>
    %367 = vector.extract %366[0, 0, 0] : f32 from vector<1x1x1xf32>
    %368 = vector.broadcast %367 : f32 to vector<1x1xf32>
    %cst_128 = arith.constant 1.000000e+00 : f32
    %369 = vector.broadcast %cst_128 : f32 to vector<23x1xf32>
    %370 = arith.subf %369, %362 : vector<23x1xf32>
    %371 = arith.mulf %357, %370 : vector<23x1xf32>
    %372 = vector.shape_cast %371 : vector<23x1xf32> to vector<1x23x1xf32>
    %cst_129 = arith.constant dense<0.000000e+00> : vector<1xf32>
    %373 = vector.multi_reduction <add>, %372, %cst_129 [1, 2] : vector<1x23x1xf32> to vector<1xf32>
    %374 = vector.shape_cast %373 : vector<1xf32> to vector<1x1x1xf32>
    %375 = vector.extract %374[0, 0, 0] : f32 from vector<1x1x1xf32>
    %376 = vector.broadcast %375 : f32 to vector<1x1xf32>
    %377 = vector.shape_cast %368 : vector<1x1xf32> to vector<1x1xf32>
    %378 = vector.broadcast %377 : vector<1x1xf32> to vector<8x128xf32>
    %c0_130 = arith.constant 0 : index
    %c0_131 = arith.constant 0 : index
    %379 = vector.load %arg6[%c0_130, %c0_131] : memref<8x128xf32, #tpu.memory_space<vmem>>, vector<8x128xf32>
    tpu.vector_store %arg6[%c0_130, %c0_131], %378 {strides = array<i32>} : memref<8x128xf32, #tpu.memory_space<vmem>>, vector<8x128xf32>,
    %380 = vector.shape_cast %376 : vector<1x1xf32> to vector<1x1xf32>
    %381 = vector.broadcast %380 : vector<1x1xf32> to vector<8x128xf32>
    %c0_132 = arith.constant 0 : index
    %c0_133 = arith.constant 0 : index
    %382 = vector.load %arg7[%c0_132, %c0_133] : memref<8x128xf32, #tpu.memory_space<vmem>>, vector<8x128xf32>
    tpu.vector_store %arg7[%c0_132, %c0_133], %381 {strides = array<i32>} : memref<8x128xf32, #tpu.memory_space<vmem>>, vector<8x128xf32>,
    return
  }
  func.func @transform_0(%arg0: i32) -> (i32, i32) {
    %c0_i32 = arith.constant 0 : i32
    %c0_i32_0 = arith.constant 0 : i32
    return %arg0, %c0_i32 : i32, i32
  }
  func.func @transform_1(%arg0: i32) -> (i32, i32) {
    %c0_i32 = arith.constant 0 : i32
    %c0_i32_0 = arith.constant 0 : i32
    return %arg0, %c0_i32 : i32, i32
  }
  func.func @transform_2(%arg0: i32) -> (i32, i32) {
    %c0_i32 = arith.constant 0 : i32
    %c0_i32_0 = arith.constant 0 : i32
    %c0_i32_1 = arith.constant 0 : i32
    return %c0_i32, %c0_i32_0 : i32, i32
  }
  func.func @transform_3(%arg0: i32) -> (i32, i32) {
    %c0_i32 = arith.constant 0 : i32
    %c0_i32_0 = arith.constant 0 : i32
    %c0_i32_1 = arith.constant 0 : i32
    return %c0_i32, %c0_i32_0 : i32, i32
  }
  func.func @transform_4(%arg0: i32) -> (i32, i32) {
    %c0_i32 = arith.constant 0 : i32
    %c0_i32_0 = arith.constant 0 : i32
    return %arg0, %c0_i32 : i32, i32
  }
  func.func @transform_5(%arg0: i32) -> (i32, i32) {
    %c0_i32 = arith.constant 0 : i32
    %c0_i32_0 = arith.constant 0 : i32
    return %arg0, %c0_i32 : i32, i32
  }
  func.func @transform_6(%arg0: i32) -> (i32, i32) {
    %c0_i32 = arith.constant 0 : i32
    %c0_i32_0 = arith.constant 0 : i32
    return %arg0, %c0_i32 : i32, i32
  }
}

</mosaic_0001>

<bundles_post_ra>
// kernel: dalle_forward.1
= control target key start
LH: loop header
LB: loop body
LE: loop exit
PB: predicated region body
PF: predicated region fallthrough
CT: control target
= control target key end

     0   :  { %12 = vsyncpa [#allocation3], 0  ;;  %s3138_s0 = inlined_call_operand.vmem [shape: f32[32,48], index: 0, kind: input, shape index: {}]   ;;  %s3139_s1 = inlined_call_operand.vmem [shape: s32[16,1], index: 1, kind: input, shape index: {}]   ;;  %s3140_s2 = inlined_call_operand.vmem [shape: bf16[256,128], index: 2, kind: input, shape index: {}]   ;;  %s3141_s3 = inlined_call_operand.vmem [shape: f32[104,128], index: 3, kind: input, shape index: {}]   ;;  %s3142_s4 = inlined_call_operand.hbm [shape: f32[48,128], index: 4, kind: output, shape index: {0}]   ;;  %s3143_s5 = inlined_call_operand.vmem [shape: f32[16,128], index: 5, kind: output, shape index: {1}]   ;;  %s3144_s6 = inlined_call_operand.vmem [shape: f32[16,128], index: 6, kind: output, shape index: {2}]  }
   0x1   :  { %14 = vsyncpa [#allocation3 + $0x1], 0  ;;  %s2510_s21 = smov 0   ;;  %s2512_s22 = smov 0  }
   0x2   :  { %s2514_s23 = smov 0   ;;  %s2516_s24 = smov 0  }
   0x3 LB: > { %s2531_s25 = sadd.s32 4294967295, %s2460_s24   ;;  %s2074_s26 = sadd.s32 4294967294, %s2460_s24   ;;  %s2460_s24 = sphi %s2516_s24, %s3150_s24   ;;  %s2456_s23 = sphi %s2514_s23, %s3149_s23   ;;  %s2452_s22 = sphi %s2512_s22, %s3148_s22   ;;  %s2448_s21 = sphi %s2510_s21, %s3147_s21  }
   0x4   : > { %s2535_s27 = sadd.s32 1, %s2460_s24   ;;  %s121_s28 = sadd.s32 1, %s2456_s23 }
   0x5   : > { %s118_s29 = ssub.s32 %s2460_s24, %s2535_s27  ;;  %p131_p0 = scmp.ne.s32.totalorder %s2456_s23, %s2452_s22 }
   0x6   : > { %p119_p1 = scmp.eq.s32.totalorder %s118_s29, 0  ;;  %p132_p2 = scmp.eq.s32.totalorder %s2531_s25, 1 }
   0x7   : > { %p137_p3 = scmp.ne.s32.totalorder %s2452_s22, %s2448_s21  ;;  %p138_p4 = scmp.eq.s32.totalorder %s2074_s26, 1 }
   0x8   : > { %s2546_s30 = scalar_select %p119_p1, %s2456_s23, %s121_s28  }
   0x9   : > { %p2548_p5 = por %p132_p2, %p131_p0  ;;  %p2552_p6 = por %p138_p4, %p137_p3 }
   0xa   : > { %p2077_p7 = scmp.ge.s32.totalorder %s2460_s24, 1  ;;  %p230_p8 = scmp.lt.s32.totalorder %s2460_s24, 3 }
   0xc   : > { %p231_p9 = pnand %p2077_p7, %p230_p8 }
   0xd   : > { %s2078_s13 = sshll.u32 (!%p231_p9), %s2531_s25, 1  ;;  %s2462_s17 = smov (!%p231_p9), 16  }
   0xe   : > { %234 = sbr.rel (%p231_p9) target bundleno = 5763 (0x1683), region = 36  ;;  %p273_p10 = scmp.lt.s32.totalorder (!%p231_p9), %s2078_s13, 3 }
   0xf   : > { %p278_p11 = scmp.lt.s32.totalorder (!%p231_p9), %s2531_s25, 1  ;;  %s2468_s15 = smov (!%p231_p9), 112  }
  0x10   : > { %s2470_s16 = smov (!%p231_p9), 48   ;;  %s2472_s20 = smov (!%p231_p9), 32  }
  0x13   : > { %v299_v0 = vld [vmem:[%s3141_s3 + $0x4a] sm:$0xff]  ;;  %v298_v1 = vld [vmem:[%s3141_s3 + $0x42] sm:$0xff]  ;;  %vm334_vm0 = vcmask 130048   ;;  %v297_v2 = vld [vmem:[%s3141_s3 + $0x3a] sm:$0xff]  ;;  %s3152_s13 = smov (!%p273_p10, %s2078_s13), 3  ;;  %vm304_vm1 = vcmask 392192   ;;  %v389_v25 = vlaneseq }
  0x14   : > { %321 = vmatpush.msra.mxu0 %v299_v0  ;;  %v302_v3 = vld [vmem:[%s3141_s3 + $0x5b] sm:$0xff]  ;;  %v296_v4 = vld [vmem:[%s3141_s3 + $0x32] sm:$0xff]  ;;  %v295_v5 = vld [vmem:[%s3141_s3 + $0x2a] sm:$0xff]  ;;  %s2079_s28 = sshll.u32 %s3152_s13, 3  ;;  %vm382_vm2 = vcmask 261248   ;;  %v2463_v46 = vmov 0  }
  0x15   : > { %2085 = vmatpush.xpose.msk.msra.mxu1 %vm334_vm0, %v302_v3  ;;  %s276_s10 = scalar_lea.vmem %s3138_s0, %s2079_s28  ;;  %v294_v6 = vld [vmem:[%s3141_s3 + $0x22] sm:$0xff]  ;;  %v301_v9 = vld [vmem:[%s3141_s3 + $0x53] sm:$0xff]  ;;  %v2283_v10 = vld [vmem:[%s3141_s3 + $0x52] ss:$0 sm:$0xff]  ;;  %v2598_v26 = vand.u32 127, %v389_v25  ;;  %2271 = vset.pattern.permute.xlu1 %v2463_v46  ;;  %v2464_v63 = vmov 0.0  }
  0x16   : > { %322 = vmatpush.msra.mxu0 %v298_v1  ;;  %v292_v7 = vld [vmem:[%s276_s10] sm:$0xff]  ;;  %v293_v8 = vld [vmem:[%s276_s10 + $0x8] sm:$0xff]  ;;  %s279_s18 = scalar_select %p278_p11, %s2531_s25, 1  ;;  %2270 = vset.pattern.permute.xlu2 %v2463_v46  ;;  %vm1848_vm10 = vcmask 1046528   ;;  %vm510_vm13 = vcmask 261120  }
  0x17   : > { %2282 = vset.pattern.permute.xlu0 %v2463_v46  ;;  %v2195_v48 = vld [vmem:[%s3140_s2 + $0x68] sm:$0xff]  ;;  %v2194_v49 = vld [vmem:[%s3140_s2 + $0x60] sm:$0xff]  ;;  %s2469_s13 = smov 80   ;;  %s2210_s10 = smul.u32 24, %s2531_s25 }
  0x18   : > { %323 = vmatpush.msra.mxu0 %v297_v2  ;;  %s2606_s19 = sshll.u32 %s279_s18, 3  ;;  %2211 = vmatpush.bf16.xpose.msra.mxu2 %v2195_v48  ;;  %s2471_s18 = smov 64  }
  0x19   : > { %2086 = vmatpush.xpose.msk.msra.mxu1 %vm334_vm0, %v301_v9  ;;  %s281_s28 = scalar_lea.vmem %s3139_s1, %s2606_s19  ;;  %s2418_s25 = scalar_lea.hbm %s3142_s4, 48 }
  0x1a   : > { %324 = vmatpush.msra.mxu0 %v296_v4  ;;  %v427_v47 = vld [vmem:[%s281_s28] sm:$0xff]  ;;  %s2467_s28 = smov 96  }
  0x1c   : > { %325 = vmatpush.msra.mxu0 %v295_v5  ;;  %v2465_v5 = vmov 1.0|1.0  }
  0x1d   : > { %475 = vmatpush.bf16.xpose.msrb.mxu1 %v2195_v48  ;;  %v2670_v48 = vld [vmem:[%s3141_s3] ss:$0 sm:$0xff] }
  0x1e   : > { %326 = vmatpush.msra.mxu0 %v294_v6 }
  0x1f   : > { %2083 = vmatmul.msk.f32.vlgmr.msra.gmra.mxu0 %vm304_vm1, %v292_v7 }
  0x20   : > { %2212 = vmatpush.bf16.xpose.msra.mxu2 %v2194_v49 }
  0x25   : > { %476 = vmatpush.bf16.xpose.msrb.mxu1 %v2194_v49  ;;  %v2677_v49 = vld [vmem:[%s3140_s2 + $0x8] sm:$0xff] }
  0x26   : > { %622 = vmatpush.bf16.msra.mxu3 %v2677_v49 }
  0x27   : > { %2084 = vmatmul.msk.f32.gmra.mxu0 %vm304_vm1, %v293_v8 }
  0x9c   : > { %v328_v11 = vpop.f32.mrf.mxu0 }
  0x9d   : > { %v329_v12 = vadd.f32 %v2283_v10, %v328_v11  ;;  %v452_v11 = vld [vmem:[%s3141_s3 + $0xa] sm:$0xff] }
  0x9f   : > { %2087 = vmatmul.msk.f32.vlgmr.msra.gmra.mxu1 %vm334_vm0, %v329_v12 }
  0xa4   : > { %v331_v13 = vpop.f32.mrf.mxu0 }
  0xa5   : > { %v332_v14 = vadd.f32 %v2283_v10, %v331_v13 }
  0xa7   : > { %2088 = vmatmul.msk.f32.gmra.mxu1 %vm334_vm0, %v332_v14 }
 0x11c   : > { %v364_v15 = vpop.f32.mrf.mxu1 }
 0x11d   : > { %v370_v16 = vmul.f32 2.0, %v364_v15  ;;  %v453_v15 = vld [vmem:[%s3141_s3 + $0x12] sm:$0xff] }
 0x11f   : > { %374 = vrot.lane.b32.xlu0 %v370_v16, %s2462_s17 }
 0x124   : > { %v367_v17 = vpop.f32.mrf.mxu1 }
 0x125   : > { %v371_v18 = vmul.f32 2.0, %v367_v17 }
 0x127   : > { %376 = vrot.lane.b32.xlu0 %v371_v18, %s2462_s17 }
 0x191   : > { %v375_v19 = vpop.permute.xlu0 %374 }
 0x192   : > { %v380_v20 = vsub.f32 %v2283_v10, %v375_v19  ;;  %v454_v19 = vld [vmem:[%s3141_s3 + $0x1a] sm:$0xff] }
 0x194   : > { %v383_v21 = vsel %vm382_vm2, %v380_v20, inf }
 0x195   : > { %384 = vmin.xlane.f32.xlu1 %v383_v21 }
 0x199   : > { %v377_v22 = vpop.permute.xlu0 %376 }
 0x19a   : > { %v381_v23 = vsub.f32 %v2283_v10, %v377_v22 }
 0x19c   : > { %v386_v24 = vsel %vm382_vm2, %v381_v23, inf }
 0x19d   : > { %387 = vmin.xlane.f32.xlu2 %v386_v24  ;;  %v2466_v24 = vmov 32.0  }
 0x19e   : > { %2294 = vrcp.f32 %v2466_v24 }
 0x1ae   : > { %393 = vrot.lane.b32.xlu1 %v2598_v26, %s2462_s17 }
 0x208   : > { %v385_v27 = vpop.xlane.xlu1 %384 }
 0x209   : > { %vm391_vm3 = vcmp.le.f32.partialorder %v380_v20, %v385_v27  ;;  %v2295_v27 = vpop.eup %2294 }
 0x20a   : > { %vm525_vm14 = vweird.f32 %v2295_v27 }
 0x210   : > { %v388_v28 = vpop.xlane.xlu2 %387 }
 0x211   : > { %vm392_vm4 = vcmp.le.f32.partialorder %v381_v23, %v388_v28  ;;  %v521_v28 = vmul.f32 32.0, %v2295_v27 }
 0x220   : > { %v394_v29 = vpop.permute.xlu1 %393 }
 0x221   : > { %v395_v30 = vsel %vm391_vm3, %v394_v29, 16  ;;  %v396_v31 = vsel %vm392_vm4, %v394_v29, 16  ;;  %v522_v29 = vsub.f32 1.0, %v521_v28 }
 0x222   : > { %v397_v32 = vsel %vm382_vm2, %v395_v30, 2147483647  ;;  %v412_v33 = vsel %vm382_vm2, %v396_v31, 2147483647 }
 0x223   : > { %v399_v34 = vshra.s32 %v397_v32, 16  ;;  %v414_v35 = vshra.s32 %v412_v33, 16  ;;  %v398_v38 = vand.u32 65535, %v397_v32  ;;  %v413_v43 = vand.u32 65535, %v412_v33 }
 0x224   : > { %v523_v30 = vmul.f32 %v2295_v27, %v522_v29 }
 0x225   : > { %v401_v36 = vcvt.s32.f32 %v399_v34  ;;  %v416_v37 = vcvt.s32.f32 %v414_v35  ;;  %v400_v40 = vcvt.s32.f32 %v398_v38  ;;  %v415_v44 = vcvt.s32.f32 %v413_v43 }
 0x226   : > { %v524_v31 = vadd.f32 %v2295_v27, %v523_v30 }
 0x227   : > { %402 = vmin.xlane.f32.xlu2 %v401_v36  ;;  %417 = vmin.xlane.f32.xlu0 %v416_v37 }
 0x228   : > { %v2656_v32 = vsel %vm525_vm14, %v2295_v27, %v524_v31 }
 0x29a   : > { %v403_v39 = vpop.xlane.xlu2 %402  ;;  %v418_v42 = vpop.xlane.xlu0 %417 }
 0x29b   : > { %vm404_vm5 = vcmp.eq.f32.partialorder %v401_v36, %v403_v39  ;;  %vm419_vm6 = vcmp.eq.f32.partialorder %v416_v37, %v418_v42  ;;  %v409_v50 = vcvt.f32.s32 %v403_v39  ;;  %v424_v55 = vcvt.f32.s32 %v418_v42 }
 0x29c   : > { %v405_v41 = vsel %vm404_vm5, %v400_v40, inf  ;;  %v420_v45 = vsel %vm419_vm6, %v415_v44, inf }
 0x29d   : > { %406 = vmin.xlane.f32.xlu2 %v405_v41  ;;  %v410_v52 = vshll.u32 %v409_v50, 16  ;;  %v425_v58 = vshll.u32 %v424_v55, 16 }
 0x2a5   : > { %421 = vmin.xlane.f32.xlu2 %v420_v45 }
 0x2bd   : > { %431 = vperm.xlu2 %2270, %v427_v47  }
 0x310   : > { %v407_v51 = vpop.xlane.xlu2 %406 }
 0x311   : > { %v408_v53 = vcvt.f32.s32 %v407_v51 }
 0x313   : > { %v411_v54 = vadd.s32 %v410_v52, %v408_v53  ;;  %v2684_v53 = vld [vmem:[%s3140_s2] sm:$0xff] }
 0x314   : > { %623 = vmatpush.bf16.msra.mxu3 %v2684_v53 }
 0x315   : > { %v428_v56 = vadd.s32 32, %v411_v54 }
 0x317   : > { %434 = vperm.xlu1 %2271, %v428_v56  }
 0x318   : > { %v422_v57 = vpop.xlane.xlu2 %421 }
 0x319   : > { %v423_v59 = vcvt.f32.s32 %v422_v57 }
 0x31b   : > { %v426_v60 = vadd.s32 %v425_v58, %v423_v59 }
 0x31d   : > { %v429_v61 = vadd.s32 32, %v426_v60 }
 0x31f   : > { %437 = vperm.xlu1 %2271, %v429_v61  }
 0x320   : > { %v432_v62 = vpop.permute.xlu2 %431 }
 0x321   : > { %vm439_vm7 = vcmp.eq.s32.totalorder %v2598_v26, %v432_v62 }
 0x322   : > { %v2089_v0 = vsel %vm439_vm7, 1.0, %v2464_v63 }
 0x323   : > { %v1849_v2 = vrot.slane %v2089_v0, 1 }
 0x389   : > { %v435_v1 = vpop.permute.xlu1 %434 }
 0x38a   : > { %vm440_vm8 = vcmp.eq.s32.totalorder %v2598_v26, %v435_v1 }
 0x38b   : > { %v2090_v3 = vsel %vm440_vm8, 1.0, %v2464_v63  ;;  %vm2100_vm9 = vmpackc.low %vm440_vm8, %vm439_vm7 }
 0x38c   : > { %v1850_v4 = vrot.slane %v2090_v3, 1  ;;  %2101 = vmatmul.msk.bf16.vlgmr.msrb.gmra.mxu1 %vm2100_vm9, %v2465_v5 }
 0x38e   : > { %v2623_v6 = vsel %vm1848_vm10, %v1849_v2, %v1850_v4 }
 0x391   : > { %v438_v7 = vpop.permute.xlu1 %437 }
 0x392   : > { %vm441_vm11 = vcmp.eq.s32.totalorder %v2598_v26, %v438_v7 }
 0x393   : > { %v2627_v8 = vsel %vm441_vm11, 1.0, %v2464_v63  ;;  %vm2102_vm12 = vmpackc.low %vm441_vm11, %vm441_vm11  ;;  %vm678_vm11 = vcmask 195584  }
 0x394   : > { %v1852_v9 = vrot.slane %v2627_v8, 1  ;;  %2103 = vmatmul.msk.bf16.vlgmr.msra.gmra.mxu2 %vm2102_vm12, %v2465_v5 }
 0x396   : > { %v2633_v10 = vsel %vm1848_vm10, %v1850_v4, %v1852_v9 }
 0x409   : > { %v478_v12 = vpop.f32.mrf.mxu1 }
 0x40a   : > { %v2638_v13 = vadd.f32 %v478_v12, %v452_v11 }
 0x40c   : > { %v511_v14 = vsel %vm510_vm13, %v2638_v13, 0.0 }
 0x40d   : > { %512 = vadd.xlane.f32.xlu1 %v511_v14 }
 0x411   : > { %v480_v16 = vpop.f32.mrf.mxu1 }
 0x412   : > { %v2645_v17 = vadd.f32 %v480_v16, %v453_v15 }
 0x414   : > { %v514_v18 = vsel %vm510_vm13, %v2645_v17, 0.0 }
 0x415   : > { %515 = vadd.xlane.f32.xlu2 %v514_v18 }
 0x417   : > { %v483_v20 = vpop.f32.mrf.mxu2 }
 0x418   : > { %v2652_v21 = vadd.f32 %v483_v20, %v454_v19 }
 0x41a   : > { %v517_v22 = vsel %vm510_vm13, %v2652_v21, 0.0 }
 0x41b   : > { %518 = vadd.xlane.f32.xlu0 %v517_v22 }
 0x41f   : > { %v485_v23 = vpop.f32.mrf.mxu2 }
 0x480   : > { %v513_v33 = vpop.xlane.xlu1 %512 }
 0x481   : > { %v527_v34 = vmul.f32 %v2656_v32, %v513_v33 }
 0x483   : > { %v530_v35 = vsub.f32 %v2638_v13, %v527_v34 }
 0x485   : > { %v533_v36 = vmul.f32 %v530_v35, %v530_v35 }
 0x487   : > { %v536_v37 = vsel %vm510_vm13, %v533_v36, 0.0 }
 0x488   : > { %v516_v38 = vpop.xlane.xlu2 %515  ;;  %537 = vadd.xlane.f32.xlu0 %v536_v37 }
 0x489   : > { %v528_v39 = vmul.f32 %v2656_v32, %v516_v38 }
 0x48b   : > { %v531_v40 = vsub.f32 %v2645_v17, %v528_v39 }
 0x48d   : > { %v534_v41 = vmul.f32 %v531_v40, %v531_v40 }
 0x48e   : > { %v519_v42 = vpop.xlane.xlu0 %518 }
 0x48f   : > { %v529_v43 = vmul.f32 %v2656_v32, %v519_v42  ;;  %v539_v44 = vsel %vm510_vm13, %v534_v41, 0.0  ;;  %v2697_v41 = vld [vmem:[%s3141_s3 + $0x1] ss:$0 sm:$0xff] }
 0x490   : > { %540 = vadd.xlane.f32.xlu0 %v539_v44 }
 0x491   : > { %v532_v45 = vsub.f32 %v2652_v21, %v529_v43 }
 0x493   : > { %v535_v46 = vmul.f32 %v532_v45, %v532_v45 }
 0x495   : > { %v542_v47 = vsel %vm510_vm13, %v535_v46, 0.0 }
 0x498   : > { %543 = vadd.xlane.f32.xlu0 %v542_v47 }
 0x4ac   : > { %589 = vrot.lane.b32.xlu0 %v2670_v48, %s2467_s28 }
 0x4fb   : > { %v538_v50 = vpop.xlane.xlu0 %537 }
 0x4fc   : > { %v545_v51 = vmul.f32 %v538_v50, %v2656_v32 }
 0x4fe   : > { %v548_v52 = vadd.f32 1e-05, %v545_v51 }
 0x500   : > { %2296 = vrsqrt.f32 %v548_v52  ;;  %vm557_vm1 = vweird.f32 %v548_v52 }
 0x503   : > { %v541_v54 = vpop.xlane.xlu0 %540 }
 0x504   : > { %v546_v55 = vmul.f32 %v541_v54, %v2656_v32 }
 0x506   : > { %v2297_v56 = vpop.eup %2296  ;;  %v549_v57 = vadd.f32 1e-05, %v546_v55 }
 0x507   : > { %v552_v58 = vmul.f32 %v2297_v56, %v548_v52  ;;  %vm558_vm15 = vweird.f32 %v2297_v56 }
 0x508   : > { %2298 = vrsqrt.f32 %v549_v57  ;;  %vm559_vm2 = vmor %vm557_vm1, %vm558_vm15  ;;  %vm567_vm4 = vweird.f32 %v549_v57  ;;  %vm725_vm15 = vcmask 1043456  }
 0x509   : > { %v553_v59 = vmul.f32 %v2297_v56, %v552_v58 }
 0x50b   : > { %v554_v60 = vmul.f32 0.5, %v553_v59  ;;  %v544_v61 = vpop.xlane.xlu0 %543 }
 0x50c   : > { %v547_v62 = vmul.f32 %v544_v61, %v2656_v32 }
 0x50d   : > { %v555_v1 = vsub.f32 1.5, %v554_v60 }
 0x50e   : > { %v2299_v0 = vpop.eup %2298  ;;  %v550_v2 = vadd.f32 1e-05, %v547_v62 }
 0x50f   : > { %v562_v3 = vmul.f32 %v2299_v0, %v549_v57  ;;  %v556_v5 = vmul.f32 %v2297_v56, %v555_v1  ;;  %vm568_vm3 = vweird.f32 %v2299_v0 }
 0x510   : > { %2300 = vrsqrt.f32 %v550_v2  ;;  %vm569_vm5 = vmor %vm567_vm4, %vm568_vm3  ;;  %vm577_vm7 = vweird.f32 %v550_v2 }
 0x511   : > { %v563_v4 = vmul.f32 %v2299_v0, %v562_v3  ;;  %v560_v14 = vsel %vm559_vm2, %v2297_v56, %v556_v5 }
 0x512   : > { %v581_v20 = vmul.f32 %v560_v14, %v530_v35 }
 0x513   : > { %v564_v7 = vmul.f32 0.5, %v563_v4 }
 0x514   : > { %v585_v28 = vmul.f32 %v2670_v48, %v581_v20 }
 0x515   : > { %v565_v11 = vsub.f32 1.5, %v564_v7 }
 0x516   : > { %v2301_v12 = vpop.eup %2300 }
 0x517   : > { %v566_v15 = vmul.f32 %v2299_v0, %v565_v11  ;;  %v572_v16 = vmul.f32 %v2301_v12, %v550_v2  ;;  %vm578_vm6 = vweird.f32 %v2301_v12 }
 0x518   : > { %vm579_vm8 = vmor %vm577_vm7, %vm578_vm6 }
 0x519   : > { %v573_v18 = vmul.f32 %v2301_v12, %v572_v16  ;;  %v570_v19 = vsel %vm569_vm5, %v2299_v0, %v566_v15  ;;  %v2729_v0 = vshrl.u32 %v389_v25, 7 }
 0x51a   : > { %v582_v22 = vmul.f32 %v570_v19, %v531_v40 }
 0x51b   : > { %v574_v23 = vmul.f32 0.5, %v573_v18  ;;  %vm491_vm9 = vcmp.le.s32.totalorder %v2598_v26, %v2729_v0  ;;  %v2738_v11 = vadd.s32 8, %v2729_v0 }
 0x51c   : > { %v586_v24 = vmul.f32 %v2670_v48, %v582_v22  ;;  %v2751_v22 = vadd.s32 16, %v2729_v0 }
 0x51d   : > { %v575_v27 = vsub.f32 1.5, %v574_v23  ;;  %vm492_vm12 = vcmp.le.s32.totalorder %v2598_v26, %v2738_v11 }
 0x51e   : > { %v590_v29 = vpop.permute.xlu0 %589  ;;  %vm493_vm14 = vcmp.le.s32.totalorder %v2598_v26, %v2751_v22 }
 0x51f   : > { %v576_v30 = vmul.f32 %v2301_v12, %v575_v27  ;;  %v592_v31 = vadd.f32 %v590_v29, %v585_v28  ;;  %v593_v33 = vadd.f32 %v590_v29, %v586_v24 }
 0x521   : > { %v595_v34 = vpack.c.bf16 %v593_v33, %v592_v31  ;;  %v580_v36 = vsel %vm579_vm8, %v2301_v12, %v576_v30 }
 0x522   : > { %v583_v37 = vmul.f32 %v580_v36, %v532_v45 }
 0x523   : > { %2112 = vmatmul.msk.bf16.vlgmr.msra.gmra.mxu3 %vm510_vm13, %v595_v34 }
 0x524   : > { %v587_v35 = vmul.f32 %v2670_v48, %v583_v37 }
 0x526   : > { %v594_v38 = vadd.f32 %v590_v29, %v587_v35 }
 0x528   : > { %v596_v39 = vpack.c.bf16 %v594_v38, %v594_v38 }
 0x533   : > { %2113 = vmatmul.msk.bf16.gmra.mxu3 %vm510_vm13, %v596_v39 }
 0x5a6   : > { %v625_v40 = vpop.f32.mrf.mxu3 }
 0x5a7   : > { %v626_v43 = vadd.f32 %v2697_v41, %v625_v40 }
 0x5ae   : > { %v627_v42 = vpop.f32.mrf.mxu3 }
 0x5af   : > { %v628_v44 = vadd.f32 %v2697_v41, %v627_v42 }
 0x5b1   : > { %v2701_v46 = vpack.c.bf16 %v628_v44, %v626_v43 }
 0x5b3   : > { %747 = vrot.lane.b32.xlu0 %v2701_v46, %s2468_s15  ;;  %751 = vrot.lane.b32.xlu2 %v2701_v46, %s2469_s13 }
 0x5b6   : > { %v630_v45 = vpop.f32.mrf.mxu3 }
 0x5b7   : > { %v631_v47 = vadd.f32 %v2697_v41, %v630_v45 }
 0x5b9   : > { %v2708_v50 = vpack.c.bf16 %v631_v47, %v631_v47 }
 0x5bb   : > { %753 = vrot.lane.b32.xlu1 %v2708_v50, %s2469_s13  ;;  %638 = vrot.lane.b32.xlu0 %v2701_v46, %s2467_s28 }
 0x5bc   : > { %749 = vrot.lane.b32.xlu2 %v2708_v50, %s2468_s15 }
 0x5be   : > { %v632_v51 = vpop.f32.mrf.mxu3 }
 0x5c3   : > { %640 = vrot.lane.b32.xlu1 %v2708_v50, %s2467_s28 }
 0x60d   : > { %v752_v56 = vpop.permute.xlu2 %751 }
 0x60e   : > { %v762_v59 = vsel %vm334_vm0, %v752_v56, 0 }
 0x616   : > { %v750_v62 = vpop.permute.xlu2 %749 }
 0x625   : > { %v748_v55 = vpop.permute.xlu0 %747 }
 0x62d   : > { %v754_v52 = vpop.permute.xlu1 %753  ;;  %v639_v60 = vpop.permute.xlu0 %638 }
 0x62e   : > { %v765_v54 = vsel %vm334_vm0, %v754_v52, 0  ;;  %v649_v61 = vsel %vm334_vm0, %v639_v60, 0 }
 0x62f   : > { %773 = vmatpush.bf16.xpose.msrb.mxu3 %v765_v54 }
 0x635   : > { %v641_v57 = vpop.permute.xlu1 %640 }
 0x636   : > { %v652_v58 = vsel %vm334_vm0, %v641_v57, 0 }
 0x637   : > { %660 = vmatpush.bf16.xpose.msra.mxu1 %v652_v58  ;;  %774 = vmatpush.bf16.xpose.msrb.mxu3 %v762_v59 }
 0x63e   : > { %2118 = vmatmul.msk.bf16.vlgmr.msrb.gmra.mxu3 %vm334_vm0, %v748_v55 }
 0x63f   : > { %661 = vmatpush.bf16.xpose.msra.mxu1 %v649_v61 }
 0x646   : > { %2114 = vmatmul.msk.bf16.vlgmr.msra.gmra.mxu1 %vm334_vm0, %v2701_v46 }
 0x64e   : > { %2119 = vmatmul.msk.bf16.gmra.mxu3 %vm334_vm0, %v750_v62 }
 0x656   : > { %2115 = vmatmul.msk.bf16.gmra.mxu1 %vm334_vm0, %v2708_v50 }
 0x6c1   : > { %v776_v1 = vpop.f32.mrf.mxu3 }
 0x6c2   : > { %v785_v2 = vmul.f32 0.25, %v776_v1 }
 0x6c3   : > { %v663_v3 = vpop.f32.mrf.mxu1 }
 0x6c4   : > { %v672_v4 = vmul.f32 0.25, %v663_v3  ;;  %v788_v5 = vsel %vm491_vm9, %v785_v2, -1e+30 }
 0x6c5   : > { %v791_v7 = vsel %vm678_vm11, %v788_v5, -inf }
 0x6c6   : > { %792 = vmax.xlane.f32.xlu1 %v791_v7  ;;  %v675_v25 = vsel %vm491_vm9, %v672_v4, -1e+30 }
 0x6c7   : > { %v679_v12 = vsel %vm678_vm11, %v675_v25, -inf }
 0x6c8   : > { %680 = vmax.xlane.f32.xlu2 %v679_v12 }
 0x6c9   : > { %v778_v14 = vpop.f32.mrf.mxu3 }
 0x6ca   : > { %v786_v15 = vmul.f32 0.25, %v778_v14 }
 0x6cb   : > { %v665_v16 = vpop.f32.mrf.mxu1 }
 0x6cc   : > { %v673_v18 = vmul.f32 0.25, %v665_v16  ;;  %v789_v19 = vsel %vm492_vm12, %v786_v15, -1e+30 }
 0x6cd   : > { %v794_v20 = vsel %vm678_vm11, %v789_v19, -inf }
 0x6ce   : > { %795 = vmax.xlane.f32.xlu0 %v794_v20  ;;  %v676_v23 = vsel %vm492_vm12, %v673_v18, -1e+30 }
 0x6cf   : > { %v682_v24 = vsel %vm678_vm11, %v676_v23, -inf }
 0x6d0   : > { %683 = vmax.xlane.f32.xlu1 %v682_v24 }
 0x6d1   : > { %v781_v27 = vpop.f32.mrf.mxu3 }
 0x6d2   : > { %v787_v28 = vmul.f32 0.25, %v781_v27 }
 0x6d3   : > { %v668_v29 = vpop.f32.mrf.mxu1 }
 0x6d4   : > { %v674_v30 = vmul.f32 0.25, %v668_v29  ;;  %v790_v31 = vsel %vm493_vm14, %v787_v28, -1e+30 }
 0x6d5   : > { %v797_v33 = vsel %vm678_vm11, %v790_v31, -inf }
 0x6d6   : > { %798 = vmax.xlane.f32.xlu0 %v797_v33  ;;  %v677_v34 = vsel %vm493_vm14, %v674_v30, -1e+30 }
 0x6d7   : > { %v685_v36 = vsel %vm678_vm11, %v677_v34, -inf }
 0x6d8   : > { %686 = vmax.xlane.f32.xlu1 %v685_v36 }
 0x6d9   : > { %v783_v37 = vpop.f32.mrf.mxu3 }
 0x6db   : > { %v670_v35 = vpop.f32.mrf.mxu1 }
 0x6ea   : > { %828 = vrot.lane.b32.xlu0 %v2708_v50, %s2470_s16 }
 0x739   : > { %v793_v38 = vpop.xlane.xlu1 %792 }
 0x73a   : > { %v800_v39 = vsub.f32 %v788_v5, %v793_v38 }
 0x73b   : > { %v681_v42 = vpop.xlane.xlu2 %680 }
 0x73c   : > { %v803_v40 = vmul.f32 1.442695, %v800_v39  ;;  %v688_v51 = vsub.f32 %v675_v25, %v681_v42 }
 0x73e   : > { %2302 = vpow2.f32 %v803_v40  ;;  %v691_v57 = vmul.f32 1.442695, %v688_v51 }
 0x741   : > { %v796_v43 = vpop.xlane.xlu0 %795 }
 0x742   : > { %v801_v44 = vsub.f32 %v789_v19, %v796_v43 }
 0x743   : > { %v684_v45 = vpop.xlane.xlu1 %683 }
 0x744   : > { %v2303_v47 = vpop.eup %2302  ;;  %v805_v52 = vmul.f32 1.442695, %v801_v44  ;;  %v689_v54 = vsub.f32 %v676_v23, %v684_v45 }
 0x745   : > { %v809_v55 = vsel %vm678_vm11, %v2303_v47, 0.0 }
 0x746   : > { %2304 = vpow2.f32 %v805_v52  ;;  %v693_v56 = vmul.f32 1.442695, %v689_v54  ;;  %810 = vadd.xlane.f32.xlu2 %v809_v55 }
 0x748   : > { %2306 = vpow2.f32 %v693_v56 }
 0x749   : > { %v799_v58 = vpop.xlane.xlu0 %798  ;;  %2308 = vpow2.f32 %v691_v57 }
 0x74a   : > { %v802_v60 = vsub.f32 %v790_v31, %v799_v58 }
 0x74b   : > { %v687_v14 = vpop.xlane.xlu1 %686 }
 0x74c   : > { %v2305_v59 = vpop.eup %2304  ;;  %v807_v2 = vmul.f32 1.442695, %v802_v60  ;;  %v690_v15 = vsub.f32 %v677_v34, %v687_v14 }
 0x74d   : > { %v812_v61 = vsel %vm678_vm11, %v2305_v59, 0.0 }
 0x74e   : > { %v2307_v62 = vpop.eup %2306  ;;  %813 = vadd.xlane.f32.xlu1 %v812_v61  ;;  %2310 = vpow2.f32 %v807_v2  ;;  %v695_v16 = vmul.f32 1.442695, %v690_v15 }
 0x74f   : > { %v700_v1 = vsel %vm678_vm11, %v2307_v62, 0.0  ;;  %v2309_v3 = vpop.eup %2308 }
 0x750   : > { %701 = vadd.xlane.f32.xlu0 %v700_v1  ;;  %v697_v4 = vsel %vm678_vm11, %v2309_v3, 0.0  ;;  %2312 = vpow2.f32 %v695_v16 }
 0x754   : > { %v2311_v5 = vpop.eup %2310 }
 0x755   : > { %v815_v12 = vsel %vm678_vm11, %v2311_v5, 0.0 }
 0x756   : > { %698 = vadd.xlane.f32.xlu1 %v697_v4  ;;  %v2313_v18 = vpop.eup %2312 }
 0x757   : > { %v703_v19 = vsel %vm678_vm11, %v2313_v18, 0.0 }
 0x75c   : > { %v829_v7 = vpop.permute.xlu0 %828 }
 0x75d   : > { %v838_v25 = vsel %vm725_vm15, %v829_v7, 0 }
 0x75e   : > { %826 = vrot.lane.b32.xlu2 %v2701_v46, %s2470_s16  ;;  %846 = vmatpush.bf16.msrb.mxu2 %v838_v25 }
 0x75f   : > { %816 = vadd.xlane.f32.xlu1 %v815_v12 }
 0x766   : > { %716 = vrot.lane.b32.xlu2 %v2708_v50, %s2471_s18 }
 0x778   : > { %714 = vrot.lane.b32.xlu1 %v2701_v46, %s2471_s18 }
 0x780   : > { %877 = vrot.lane.b32.xlu1 %v2677_v49, %s2472_s20 }
 0x788   : > { %875 = vrot.lane.b32.xlu1 %v2684_v53, %s2472_s20 }
 0x78f   : > { %704 = vadd.xlane.f32.xlu2 %v703_v19 }
 0x7a7   : > { %909 = vrot.lane.b32.xlu2 %v2697_v41, %s2472_s20 }
 0x7b9   : > { %v811_v20 = vpop.xlane.xlu2 %810 }
 0x7ba   : > { %2314 = vrcp.f32 %v811_v20 }
 0x7c0   : > { %v2315_v27 = vpop.eup %2314 }
 0x7c1   : > { %v814_v23 = vpop.xlane.xlu1 %813  ;;  %v827_v24 = vpop.permute.xlu2 %826  ;;  %v821_v50 = vmul.f32 %v2315_v27, %v2303_v47 }
 0x7c2   : > { %2316 = vrcp.f32 %v814_v23  ;;  %847 = vmatpush.bf16.msrb.mxu2 %v827_v24 }
 0x7c3   : > { %v702_v38 = vpop.xlane.xlu0 %701 }
 0x7c8   : > { %v2317_v28 = vpop.eup %2316 }
 0x7c9   : > { %v822_v29 = vmul.f32 %v2317_v28, %v2305_v59  ;;  %v699_v30 = vpop.xlane.xlu1 %698  ;;  %v717_v46 = vpop.permute.xlu2 %716 }
 0x7ca   : > { %v727_v31 = vsel %vm725_vm15, %v717_v46, 0 }
 0x7cb   : > { %735 = vmatpush.bf16.msrb.mxu0 %v727_v31  ;;  %v824_v33 = vpack.c.bf16 %v822_v29, %v821_v50 }
 0x7cd   : > { %2120 = vmatmul.msk.bf16.vlgmr.msrb.gmra.mxu2 %vm678_vm11, %v824_v33 }
 0x7d2   : > { %v817_v34 = vpop.xlane.xlu1 %816 }
 0x7d3   : > { %2318 = vrcp.f32 %v817_v34 }
 0x7d4   : > { %2320 = vrcp.f32 %v699_v30 }
 0x7d5   : > { %2322 = vrcp.f32 %v702_v38 }
 0x7d9   : > { %v2319_v36 = vpop.eup %2318 }
 0x7da   : > { %v823_v37 = vmul.f32 %v2319_v36, %v2311_v5  ;;  %v2321_v39 = vpop.eup %2320 }
 0x7db   : > { %v2323_v40 = vpop.eup %2322  ;;  %v709_v42 = vmul.f32 %v2321_v39, %v2309_v3 }
 0x7dc   : > { %v825_v35 = vpack.c.bf16 %v823_v37, %v823_v37  ;;  %v710_v49 = vmul.f32 %v2323_v40, %v2307_v62 }
 0x7de   : > { %2121 = vmatmul.msk.bf16.gmra.mxu2 %vm678_vm11, %v825_v35  ;;  %v712_v41 = vpack.c.bf16 %v710_v49, %v709_v42 }
 0x7ea   : > { %v715_v43 = vpop.permute.xlu1 %714 }
 0x7eb   : > { %736 = vmatpush.bf16.msrb.mxu0 %v715_v43 }
 0x7ee   : > { %2116 = vmatmul.msk.bf16.vlgmr.msrb.gmra.mxu0 %vm678_vm11, %v712_v41 }
 0x7f2   : > { %v878_v57 = vpop.permute.xlu1 %877 }
 0x7f3   : > { %893 = vmatpush.bf16.msrb.mxu1 %v878_v57 }
 0x7fa   : > { %v876_v59 = vpop.permute.xlu1 %875 }
 0x7fb   : > { %894 = vmatpush.bf16.msrb.mxu1 %v876_v59 }
 0x802   : > { %v705_v44 = vpop.xlane.xlu2 %704 }
 0x803   : > { %2324 = vrcp.f32 %v705_v44  ;;  %v2199_v44 = vld [vmem:[%s3140_s2 + $0x18] sm:$0xff] }
 0x804   : > { %1020 = vmatpush.bf16.msra.mxu0 %v2199_v44 }
 0x809   : > { %v2325_v45 = vpop.eup %2324 }
 0x80a   : > { %v711_v53 = vmul.f32 %v2325_v45, %v2313_v18  ;;  %v910_v16 = vpop.permute.xlu2 %909 }
 0x80c   : > { %v713_v47 = vpack.c.bf16 %v711_v53, %v711_v53 }
 0x80e   : > { %2117 = vmatmul.msk.bf16.gmra.mxu0 %vm678_vm11, %v713_v47 }
 0x850   : > { %v849_v51 = vpop.f32.mrf.mxu2 }
 0x858   : > { %v851_v52 = vpop.f32.mrf.mxu2 }
 0x859   : > { %v2272_v54 = vpack.i.bf16 %v851_v52, %v849_v51  ;;  %v2198_v51 = vld [vmem:[%s3140_s2 + $0x10] sm:$0xff] }
 0x85a   : > { %1021 = vmatpush.bf16.msra.mxu0 %v2198_v51 }
 0x85b   : > { %2273 = vrot.lane.b32.xlu0 %v2272_v54, %s2462_s17 }
 0x861   : > { %v854_v55 = vpop.f32.mrf.mxu2 }
 0x862   : > { %865 = vrot.lane.b32.xlu1 %v854_v55, %s2462_s17 }
 0x869   : > { %v856_v56 = vpop.f32.mrf.mxu2 }
 0x86b   : > { %v738_v58 = vpop.f32.mrf.mxu0 }
 0x873   : > { %v740_v60 = vpop.f32.mrf.mxu0 }
 0x88b   : > { %v743_v61 = vpop.f32.mrf.mxu0 }
 0x893   : > { %v745_v62 = vpop.f32.mrf.mxu0 }
 0x8cd   : > { %v2274_v1 = vpop.permute.xlu0 %2273 }
 0x8ce   : > { %v2276_v2 = vunpack.i.h.bf16 %v2274_v1  ;;  %v2275_v3 = vunpack.i.l.bf16 %v2274_v1 }
 0x8d0   : > { %v870_v4 = vsel %vm334_vm0, %v738_v58, %v2275_v3  ;;  %v871_v5 = vsel %vm334_vm0, %v740_v60, %v2276_v2 }
 0x8d1   : > { %v873_v7 = vpack.c.bf16 %v871_v5, %v870_v4 }
 0x8d3   : > { %2122 = vmatmul.msk.bf16.vlgmr.msrb.gmra.mxu1 %vm510_vm13, %v873_v7 }
 0x8d4   : > { %v866_v25 = vpop.permute.xlu1 %865 }
 0x8d5   : > { %v872_v12 = vsel %vm334_vm0, %v743_v61, %v866_v25 }
 0x8d6   : > { %v874_v14 = vpack.c.bf16 %v872_v12, %v872_v12 }
 0x8e3   : > { %2123 = vmatmul.msk.bf16.gmra.mxu1 %vm510_vm13, %v874_v14 }
 0x950   : > { %v896_v15 = vpop.f32.mrf.mxu1 }
 0x951   : > { %v905_v18 = vadd.f32 %v896_v15, %v2638_v13 }
 0x953   : > { %v2801_v19 = vadd.f32 %v910_v16, %v905_v18 }
 0x955   : > { %v915_v20 = vsel %vm510_vm13, %v2801_v19, 0.0 }
 0x956   : > { %916 = vadd.xlane.f32.xlu1 %v915_v20 }
 0x958   : > { %v898_v23 = vpop.f32.mrf.mxu1 }
 0x959   : > { %v906_v24 = vadd.f32 %v898_v23, %v2645_v17 }
 0x95b   : > { %v2806_v27 = vadd.f32 %v910_v16, %v906_v24 }
 0x95d   : > { %v918_v28 = vsel %vm510_vm13, %v2806_v27, 0.0 }
 0x95e   : > { %919 = vadd.xlane.f32.xlu0 %v918_v28 }
 0x960   : > { %v901_v50 = vpop.f32.mrf.mxu1 }
 0x961   : > { %v907_v29 = vadd.f32 %v901_v50, %v2652_v21 }
 0x963   : > { %v2811_v30 = vadd.f32 %v910_v16, %v907_v29 }
 0x965   : > { %v921_v13 = vsel %vm510_vm13, %v2811_v30, 0.0 }
 0x966   : > { %922 = vadd.xlane.f32.xlu2 %v921_v13 }
 0x968   : > { %v903_v46 = vpop.f32.mrf.mxu1 }
 0x9c9   : > { %v917_v31 = vpop.xlane.xlu1 %916 }
 0x9ca   : > { %v924_v33 = vmul.f32 %v917_v31, %v2656_v32 }
 0x9cc   : > { %v927_v17 = vsub.f32 %v2801_v19, %v924_v33 }
 0x9ce   : > { %v930_v34 = vmul.f32 %v927_v17, %v927_v17 }
 0x9d0   : > { %v933_v36 = vsel %vm510_vm13, %v930_v34, 0.0 }
 0x9d1   : > { %v920_v37 = vpop.xlane.xlu0 %919  ;;  %934 = vadd.xlane.f32.xlu1 %v933_v36 }
 0x9d2   : > { %v925_v35 = vmul.f32 %v920_v37, %v2656_v32 }
 0x9d4   : > { %v928_v21 = vsub.f32 %v2806_v27, %v925_v35 }
 0x9d6   : > { %v931_v38 = vmul.f32 %v928_v21, %v928_v21 }
 0x9d8   : > { %v936_v39 = vsel %vm510_vm13, %v931_v38, 0.0 }
 0x9d9   : > { %v923_v40 = vpop.xlane.xlu2 %922  ;;  %937 = vadd.xlane.f32.xlu0 %v936_v39 }
 0x9da   : > { %v926_v42 = vmul.f32 %v923_v40, %v2656_v32  ;;  %v2200_v40 = vld [vmem:[%s3140_s2 + $0x20] sm:$0xff] }
 0x9dc   : > { %v929_v49 = vsub.f32 %v2811_v30, %v926_v42  ;;  %v2286_v42 = vld [vmem:[%s3141_s3 + $0x2] ss:$0 sm:$0xff] }
 0x9de   : > { %v932_v43 = vmul.f32 %v929_v49, %v929_v49 }
 0x9e0   : > { %v939_v41 = vsel %vm510_vm13, %v932_v43, 0.0 }
 0x9e1   : > { %940 = vadd.xlane.f32.xlu2 %v939_v41 }
 0x9ea   : > { %981 = vrot.lane.b32.xlu1 %v2670_v48, %s2471_s18 }
 0x9ed   : > { %987 = vrot.lane.b32.xlu0 %v2670_v48, %s2472_s20 }
 0xa44   : > { %v935_v45 = vpop.xlane.xlu1 %934 }
 0xa45   : > { %v942_v53 = vmul.f32 %v935_v45, %v2656_v32 }
 0xa47   : > { %v945_v47 = vadd.f32 1e-05, %v942_v53 }
 0xa49   : > { %2326 = vrsqrt.f32 %v945_v47  ;;  %vm954_vm2 = vweird.f32 %v945_v47 }
 0xa4c   : > { %v938_v52 = vpop.xlane.xlu0 %937 }
 0xa4d   : > { %v943_v54 = vmul.f32 %v938_v52, %v2656_v32 }
 0xa4f   : > { %v2327_v55 = vpop.eup %2326  ;;  %v946_v48 = vadd.f32 1e-05, %v943_v54 }
 0xa50   : > { %v949_v56 = vmul.f32 %v2327_v55, %v945_v47  ;;  %vm955_vm1 = vweird.f32 %v2327_v55 }
 0xa51   : > { %2328 = vrsqrt.f32 %v946_v48  ;;  %vm956_vm3 = vmor %vm954_vm2, %vm955_vm1  ;;  %vm964_vm5 = vweird.f32 %v946_v48 }
 0xa52   : > { %v950_v57 = vmul.f32 %v2327_v55, %v949_v56 }
 0xa54   : > { %v951_v58 = vmul.f32 0.5, %v950_v57  ;;  %v941_v59 = vpop.xlane.xlu2 %940 }
 0xa55   : > { %v944_v60 = vmul.f32 %v941_v59, %v2656_v32 }
 0xa56   : > { %v952_v61 = vsub.f32 1.5, %v951_v58 }
 0xa57   : > { %v2329_v62 = vpop.eup %2328  ;;  %v947_v1 = vadd.f32 1e-05, %v944_v60 }
 0xa58   : > { %v953_v2 = vmul.f32 %v2327_v55, %v952_v61  ;;  %v959_v3 = vmul.f32 %v2329_v62, %v946_v48  ;;  %vm965_vm4 = vweird.f32 %v2329_v62 }
 0xa59   : > { %2330 = vrsqrt.f32 %v947_v1  ;;  %vm966_vm6 = vmor %vm964_vm5, %vm965_vm4  ;;  %vm974_vm8 = vweird.f32 %v947_v1 }
 0xa5a   : > { %v960_v4 = vmul.f32 %v2329_v62, %v959_v3  ;;  %v957_v7 = vsel %vm956_vm3, %v2327_v55, %v953_v2 }
 0xa5b   : > { %v978_v14 = vmul.f32 %v957_v7, %v927_v17 }
 0xa5c   : > { %v961_v5 = vmul.f32 0.5, %v960_v4  ;;  %v982_v18 = vpop.permute.xlu1 %981 }
 0xa5d   : > { %v984_v28 = vmul.f32 %v982_v18, %v978_v14 }
 0xa5e   : > { %v962_v25 = vsub.f32 1.5, %v961_v5 }
 0xa5f   : > { %v2331_v12 = vpop.eup %2330  ;;  %v988_v29 = vpop.permute.xlu0 %987 }
 0xa60   : > { %v963_v15 = vmul.f32 %v2329_v62, %v962_v25  ;;  %v969_v16 = vmul.f32 %v2331_v12, %v947_v1  ;;  %vm975_vm7 = vweird.f32 %v2331_v12  ;;  %v990_v31 = vadd.f32 %v988_v29, %v984_v28 }
 0xa61   : > { %vm976_vm1 = vmor %vm974_vm8, %vm975_vm7 }
 0xa62   : > { %v970_v20 = vmul.f32 %v2331_v12, %v969_v16  ;;  %v967_v23 = vsel %vm966_vm6, %v2329_v62, %v963_v15 }
 0xa63   : > { %v979_v24 = vmul.f32 %v967_v23, %v928_v21  ;;  %v2201_v21 = vld [vmem:[%s3140_s2 + $0x28] sm:$0xff] }
 0xa64   : > { %v971_v50 = vmul.f32 0.5, %v970_v20  ;;  %1080 = vmatpush.bf16.xpose.msra.mxu3 %v2201_v21 }
 0xa65   : > { %v985_v13 = vmul.f32 %v982_v18, %v979_v24 }
 0xa66   : > { %v972_v46 = vsub.f32 1.5, %v971_v50 }
 0xa67   : > { %v991_v33 = vadd.f32 %v988_v29, %v985_v13 }
 0xa68   : > { %v973_v34 = vmul.f32 %v2331_v12, %v972_v46 }
 0xa69   : > { %v993_v17 = vpack.c.bf16 %v991_v33, %v990_v31 }
 0xa6a   : > { %v977_v36 = vsel %vm976_vm1, %v2331_v12, %v973_v34 }
 0xa6b   : > { %2132 = vmatmul.msk.bf16.vlgmr.msra.gmra.mxu0 %vm510_vm13, %v993_v17  ;;  %v980_v37 = vmul.f32 %v977_v36, %v929_v49 }
 0xa6c   : > { %1081 = vmatpush.bf16.xpose.msra.mxu3 %v2200_v40 }
 0xa6d   : > { %v986_v35 = vmul.f32 %v982_v18, %v980_v37 }
 0xa6f   : > { %v992_v38 = vadd.f32 %v988_v29, %v986_v35  ;;  %v2287_v29 = vld [vmem:[%s3141_s3 + $0x3] ss:$0 sm:$0xff] }
 0xa71   : > { %v994_v39 = vpack.c.bf16 %v992_v38, %v992_v38 }
 0xa7b   : > { %2133 = vmatmul.msk.bf16.gmra.mxu0 %vm510_vm13, %v994_v39 }
 0xae8   : > { %v1023_v49 = vpop.f32.mrf.mxu0 }
 0xae9   : > { %v1024_v43 = vadd.f32 %v2286_v42, %v1023_v49 }
 0xaeb   : > { %v1032_v41 = vmul.f32 %v1024_v43, %v1024_v43 }
 0xaed   : > { %v1035_v44 = vmul.f32 %v1032_v41, %v1024_v43 }
 0xaef   : > { %v1038_v45 = vmul.f32 0.044715, %v1035_v44 }
 0xaf0   : > { %v1025_v53 = vpop.f32.mrf.mxu0 }
 0xaf1   : > { %v1041_v47 = vadd.f32 %v1038_v45, %v1024_v43  ;;  %v1026_v51 = vadd.f32 %v2286_v42, %v1025_v53 }
 0xaf3   : > { %v1044_v52 = vmul.f32 0.7978846, %v1041_v47  ;;  %v1033_v54 = vmul.f32 %v1026_v51, %v1026_v51 }
 0xaf5   : > { %v1036_v55 = vmul.f32 %v1033_v54, %v1026_v51  ;;  %2332 = vtanh.f32 %v1044_v52 }
 0xaf7   : > { %v1039_v48 = vmul.f32 0.044715, %v1036_v55 }
 0xaf8   : > { %v1028_v56 = vpop.f32.mrf.mxu0 }
 0xaf9   : > { %v1042_v57 = vadd.f32 %v1039_v48, %v1026_v51  ;;  %v1029_v58 = vadd.f32 %v2286_v42, %v1028_v56  ;;  %v2878_v48 = vld [vmem:[%s3141_s3 + $0x4] ss:$0 sm:$0xff]  ;;  %v2885_v56 = vld [vmem:[%s3140_s2 + $0x38] sm:$0xff] }
 0xafa   : > { %1215 = vmatpush.bf16.msra.mxu2 %v2885_v56 }
 0xafb   : > { %v1045_v59 = vmul.f32 0.7978846, %v1042_v57  ;;  %v1034_v60 = vmul.f32 %v1029_v58, %v1029_v58  ;;  %v2333_v61 = vpop.eup %2332 }
 0xafc   : > { %v1050_v2 = vadd.f32 1.0, %v2333_v61 }
 0xafd   : > { %2334 = vtanh.f32 %v1045_v59  ;;  %v1037_v62 = vmul.f32 %v1034_v60, %v1029_v58  ;;  %v2892_v60 = vld [vmem:[%s3140_s2 + $0x30] sm:$0xff] }
 0xafe   : > { %v1053_v25 = vmul.f32 0.5, %v1050_v2  ;;  %1216 = vmatpush.bf16.msra.mxu2 %v2892_v60 }
 0xaff   : > { %v1040_v1 = vmul.f32 0.044715, %v1037_v62 }
 0xb00   : > { %v1030_v3 = vpop.f32.mrf.mxu0  ;;  %v1056_v15 = vmul.f32 %v1053_v25, %v1024_v43 }
 0xb01   : > { %v1043_v4 = vadd.f32 %v1040_v1, %v1029_v58 }
 0xb03   : > { %v2335_v5 = vpop.eup %2334  ;;  %v1046_v7 = vmul.f32 0.7978846, %v1043_v4 }
 0xb04   : > { %v1051_v12 = vadd.f32 1.0, %v2335_v5 }
 0xb05   : > { %2336 = vtanh.f32 %v1046_v7 }
 0xb06   : > { %v1054_v14 = vmul.f32 0.5, %v1051_v12 }
 0xb08   : > { %v1057_v16 = vmul.f32 %v1054_v14, %v1026_v51 }
 0xb0a   : > { %v1059_v18 = vpack.c.bf16 %v1057_v16, %v1056_v15 }
 0xb0b   : > { %v2337_v20 = vpop.eup %2336 }
 0xb0c   : > { %1082 = vmatmul.bf16.vlgmr.msra.gmra.mxu3 %v1059_v18  ;;  %v1052_v23 = vadd.f32 1.0, %v2337_v20 }
 0xb0e   : > { %v1055_v24 = vmul.f32 0.5, %v1052_v23 }
 0xb10   : > { %v1058_v28 = vmul.f32 %v1055_v24, %v1029_v58 }
 0xb12   : > { %v1060_v50 = vpack.c.bf16 %v1058_v28, %v1058_v28 }
 0xb1c   : > { %1087 = vmatmul.bf16.gmra.mxu3 %v1060_v50 }
 0xb8f   : > { %v1083_v13 = vpop.f32.mrf.mxu3 }
 0xb90   : > { %v1084_v46 = vadd.f32 %v2287_v29, %v1083_v13 }
 0xb92   : > { %v2852_v31 = vadd.f32 %v1084_v46, %v2801_v19 }
 0xb94   : > { %v1111_v33 = vsel %vm510_vm13, %v2852_v31, 0.0 }
 0xb95   : > { %1112 = vadd.xlane.f32.xlu2 %v1111_v33 }
 0xb97   : > { %v1085_v34 = vpop.f32.mrf.mxu3 }
 0xb98   : > { %v1086_v17 = vadd.f32 %v2287_v29, %v1085_v34 }
 0xb9a   : > { %v2857_v36 = vadd.f32 %v1086_v17, %v2806_v27 }
 0xb9c   : > { %v1114_v37 = vsel %vm510_vm13, %v2857_v36, 0.0 }
 0xb9d   : > { %1115 = vadd.xlane.f32.xlu0 %v1114_v37 }
 0xb9f   : > { %v1088_v35 = vpop.f32.mrf.mxu3 }
 0xba0   : > { %v1089_v38 = vadd.f32 %v2287_v29, %v1088_v35 }
 0xba2   : > { %v2862_v39 = vadd.f32 %v1089_v38, %v2811_v30 }
 0xba4   : > { %v1117_v19 = vsel %vm510_vm13, %v2862_v39, 0.0 }
 0xba5   : > { %1118 = vadd.xlane.f32.xlu1 %v1117_v19 }
 0xba7   : > { %v1090_v21 = vpop.f32.mrf.mxu3 }
 0xc08   : > { %v1113_v40 = vpop.xlane.xlu2 %1112 }
 0xc09   : > { %v1120_v42 = vmul.f32 %v1113_v40, %v2656_v32 }
 0xc0b   : > { %v1123_v27 = vsub.f32 %v2852_v31, %v1120_v42 }
 0xc0d   : > { %v1126_v49 = vmul.f32 %v1123_v27, %v1123_v27 }
 0xc0f   : > { %v1129_v43 = vsel %vm510_vm13, %v1126_v49, 0.0 }
 0xc10   : > { %v1116_v41 = vpop.xlane.xlu0 %1115  ;;  %1130 = vadd.xlane.f32.xlu2 %v1129_v43 }
 0xc11   : > { %v1121_v44 = vmul.f32 %v1116_v41, %v2656_v32 }
 0xc13   : > { %v1124_v30 = vsub.f32 %v2857_v36, %v1121_v44 }
 0xc15   : > { %v1127_v45 = vmul.f32 %v1124_v30, %v1124_v30 }
 0xc17   : > { %v1132_v53 = vsel %vm510_vm13, %v1127_v45, 0.0 }
 0xc18   : > { %v1119_v47 = vpop.xlane.xlu1 %1118  ;;  %1133 = vadd.xlane.f32.xlu2 %v1132_v53 }
 0xc19   : > { %v1122_v51 = vmul.f32 %v1119_v47, %v2656_v32  ;;  %v2905_v47 = vld [vmem:[%s3141_s3 + $0x5] ss:$0 sm:$0xff] }
 0xc1b   : > { %v1125_v52 = vsub.f32 %v2862_v39, %v1122_v51 }
 0xc1d   : > { %v1128_v54 = vmul.f32 %v1125_v52, %v1125_v52 }
 0xc1f   : > { %v1135_v55 = vsel %vm510_vm13, %v1128_v54, 0.0 }
 0xc20   : > { %1136 = vadd.xlane.f32.xlu2 %v1135_v55 }
 0xc38   : > { %1182 = vrot.lane.b32.xlu2 %v2878_v48, %s2467_s28 }
 0xc83   : > { %v1131_v57 = vpop.xlane.xlu2 %1130 }
 0xc84   : > { %v1138_v58 = vmul.f32 %v1131_v57, %v2656_v32 }
 0xc86   : > { %v1141_v59 = vadd.f32 1e-05, %v1138_v58 }
 0xc88   : > { %2338 = vrsqrt.f32 %v1141_v59  ;;  %vm1150_vm3 = vweird.f32 %v1141_v59 }
 0xc8b   : > { %v1134_v61 = vpop.xlane.xlu2 %1133 }
 0xc8c   : > { %v1139_v62 = vmul.f32 %v1134_v61, %v2656_v32 }
 0xc8e   : > { %v2339_v1 = vpop.eup %2338  ;;  %v1142_v2 = vadd.f32 1e-05, %v1139_v62 }
 0xc8f   : > { %v1145_v3 = vmul.f32 %v2339_v1, %v1141_v59  ;;  %vm1151_vm2 = vweird.f32 %v2339_v1 }
 0xc90   : > { %2340 = vrsqrt.f32 %v1142_v2  ;;  %vm1152_vm4 = vmor %vm1150_vm3, %vm1151_vm2  ;;  %vm1160_vm6 = vweird.f32 %v1142_v2 }
 0xc91   : > { %v1146_v4 = vmul.f32 %v2339_v1, %v1145_v3 }
 0xc93   : > { %v1147_v5 = vmul.f32 0.5, %v1146_v4  ;;  %v1137_v7 = vpop.xlane.xlu2 %1136 }
 0xc94   : > { %v1140_v25 = vmul.f32 %v1137_v7, %v2656_v32 }
 0xc95   : > { %v1148_v12 = vsub.f32 1.5, %v1147_v5 }
 0xc96   : > { %v2341_v14 = vpop.eup %2340  ;;  %v1143_v15 = vadd.f32 1e-05, %v1140_v25 }
 0xc97   : > { %v1149_v16 = vmul.f32 %v2339_v1, %v1148_v12  ;;  %v1155_v18 = vmul.f32 %v2341_v14, %v1142_v2  ;;  %vm1161_vm5 = vweird.f32 %v2341_v14 }
 0xc98   : > { %2342 = vrsqrt.f32 %v1143_v15  ;;  %vm1162_vm7 = vmor %vm1160_vm6, %vm1161_vm5  ;;  %vm1170_vm1 = vweird.f32 %v1143_v15 }
 0xc99   : > { %v1156_v20 = vmul.f32 %v2341_v14, %v1155_v18  ;;  %v1153_v24 = vsel %vm1152_vm4, %v2339_v1, %v1149_v16 }
 0xc9a   : > { %v1174_v29 = vmul.f32 %v1153_v24, %v1123_v27 }
 0xc9b   : > { %v1157_v23 = vmul.f32 0.5, %v1156_v20  ;;  %v1183_v38 = vpop.permute.xlu2 %1182 }
 0xc9c   : > { %v1178_v37 = vmul.f32 %v2878_v48, %v1174_v29 }
 0xc9d   : > { %v1158_v28 = vsub.f32 1.5, %v1157_v23 }
 0xc9e   : > { %v2343_v50 = vpop.eup %2342  ;;  %v1185_v40 = vadd.f32 %v1183_v38, %v1178_v37 }
 0xc9f   : > { %v1159_v13 = vmul.f32 %v2341_v14, %v1158_v28  ;;  %v1165_v46 = vmul.f32 %v2343_v50, %v1143_v15  ;;  %vm1171_vm8 = vweird.f32 %v2343_v50 }
 0xca0   : > { %vm1172_vm2 = vmor %vm1170_vm1, %vm1171_vm8 }
 0xca1   : > { %v1166_v33 = vmul.f32 %v2343_v50, %v1165_v46  ;;  %v1163_v34 = vsel %vm1162_vm7, %v2341_v14, %v1159_v13 }
 0xca2   : > { %v1175_v17 = vmul.f32 %v1163_v34, %v1124_v30 }
 0xca3   : > { %v1167_v35 = vmul.f32 0.5, %v1166_v33 }
 0xca4   : > { %v1179_v19 = vmul.f32 %v2878_v48, %v1175_v17 }
 0xca5   : > { %v1168_v21 = vsub.f32 1.5, %v1167_v35 }
 0xca6   : > { %v1186_v42 = vadd.f32 %v1183_v38, %v1179_v19 }
 0xca7   : > { %v1169_v49 = vmul.f32 %v2343_v50, %v1168_v21 }
 0xca8   : > { %v1188_v27 = vpack.c.bf16 %v1186_v42, %v1185_v40 }
 0xca9   : > { %v1173_v43 = vsel %vm1172_vm2, %v2343_v50, %v1169_v49 }
 0xcaa   : > { %2150 = vmatmul.msk.bf16.vlgmr.msra.gmra.mxu2 %vm510_vm13, %v1188_v27  ;;  %v1176_v41 = vmul.f32 %v1173_v43, %v1125_v52 }
 0xcac   : > { %v1180_v44 = vmul.f32 %v2878_v48, %v1176_v41 }
 0xcae   : > { %v1187_v30 = vadd.f32 %v1183_v38, %v1180_v44 }
 0xcb0   : > { %v1189_v45 = vpack.c.bf16 %v1187_v30, %v1187_v30 }
 0xcba   : > { %2151 = vmatmul.msk.bf16.gmra.mxu2 %vm510_vm13, %v1189_v45 }
 0xd2d   : > { %v1218_v53 = vpop.f32.mrf.mxu2 }
 0xd2e   : > { %v1219_v54 = vadd.f32 %v2905_v47, %v1218_v53 }
 0xd35   : > { %v1220_v51 = vpop.f32.mrf.mxu2 }
 0xd36   : > { %v1221_v55 = vadd.f32 %v2905_v47, %v1220_v51 }
 0xd38   : > { %v2909_v57 = vpack.c.bf16 %v1221_v55, %v1219_v54 }
 0xd3a   : > { %1338 = vrot.lane.b32.xlu2 %v2909_v57, %s2468_s15  ;;  %1342 = vrot.lane.b32.xlu1 %v2909_v57, %s2469_s13 }
 0xd3d   : > { %v1223_v52 = vpop.f32.mrf.mxu2 }
 0xd3e   : > { %v1224_v58 = vadd.f32 %v2905_v47, %v1223_v52 }
 0xd40   : > { %v2916_v59 = vpack.c.bf16 %v1224_v58, %v1224_v58 }
 0xd42   : > { %1344 = vrot.lane.b32.xlu0 %v2916_v59, %s2469_s13  ;;  %1233 = vrot.lane.b32.xlu2 %v2916_v59, %s2467_s28 }
 0xd45   : > { %v1225_v61 = vpop.f32.mrf.mxu2 }
 0xd4a   : > { %1231 = vrot.lane.b32.xlu0 %v2909_v57, %s2467_s28  ;;  %1340 = vrot.lane.b32.xlu2 %v2916_v59, %s2468_s15 }
 0xd94   : > { %v1339_v62 = vpop.permute.xlu2 %1338 }
 0xd9c   : > { %v1234_v1 = vpop.permute.xlu2 %1233 }
 0xd9d   : > { %v1245_v2 = vsel %vm334_vm0, %v1234_v1, 0 }
 0xd9e   : > { %1253 = vmatpush.bf16.xpose.msra.mxu1 %v1245_v2 }
 0xda4   : > { %v1341_v14 = vpop.permute.xlu2 %1340 }
 0xdac   : > { %v1343_v5 = vpop.permute.xlu1 %1342 }
 0xdad   : > { %v1353_v25 = vsel %vm334_vm0, %v1343_v5, 0 }
 0xdb4   : > { %v1345_v3 = vpop.permute.xlu0 %1344 }
 0xdb5   : > { %v1356_v4 = vsel %vm334_vm0, %v1345_v3, 0 }
 0xdb6   : > { %1364 = vmatpush.bf16.xpose.msrb.mxu3 %v1356_v4 }
 0xdbc   : > { %v1232_v7 = vpop.permute.xlu0 %1231 }
 0xdbd   : > { %v1242_v12 = vsel %vm334_vm0, %v1232_v7, 0 }
 0xdbe   : > { %1254 = vmatpush.bf16.xpose.msra.mxu1 %v1242_v12  ;;  %1365 = vmatpush.bf16.xpose.msrb.mxu3 %v1353_v25 }
 0xdc5   : > { %2152 = vmatmul.msk.bf16.vlgmr.msra.gmra.mxu1 %vm334_vm0, %v2909_v57  ;;  %2156 = vmatmul.msk.bf16.vlgmr.msrb.gmra.mxu3 %vm334_vm0, %v1339_v62 }
 0xdd5   : > { %2153 = vmatmul.msk.bf16.gmra.mxu1 %vm334_vm0, %v2916_v59  ;;  %2157 = vmatmul.msk.bf16.gmra.mxu3 %vm334_vm0, %v1341_v14 }
 0xe42   : > { %v1256_v15 = vpop.f32.mrf.mxu1 }
 0xe43   : > { %v1265_v16 = vmul.f32 0.25, %v1256_v15 }
 0xe45   : > { %v1268_v18 = vsel %vm491_vm9, %v1265_v16, -1e+30 }
 0xe46   : > { %v1271_v20 = vsel %vm678_vm11, %v1268_v18, -inf }
 0xe47   : > { %1272 = vmax.xlane.f32.xlu2 %v1271_v20 }
 0xe48   : > { %v1367_v23 = vpop.f32.mrf.mxu3 }
 0xe49   : > { %v1376_v24 = vmul.f32 0.25, %v1367_v23 }
 0xe4a   : > { %v1258_v28 = vpop.f32.mrf.mxu1 }
 0xe4b   : > { %v1379_v50 = vsel %vm491_vm9, %v1376_v24, -1e+30  ;;  %v1266_v13 = vmul.f32 0.25, %v1258_v28 }
 0xe4c   : > { %v1382_v29 = vsel %vm678_vm11, %v1379_v50, -inf }
 0xe4d   : > { %1383 = vmax.xlane.f32.xlu1 %v1382_v29  ;;  %v1269_v34 = vsel %vm492_vm12, %v1266_v13, -1e+30 }
 0xe4e   : > { %v1274_v35 = vsel %vm678_vm11, %v1269_v34, -inf }
 0xe50   : > { %v1369_v46 = vpop.f32.mrf.mxu3 }
 0xe51   : > { %v1377_v33 = vmul.f32 0.25, %v1369_v46 }
 0xe52   : > { %v1261_v17 = vpop.f32.mrf.mxu1 }
 0xe53   : > { %v1380_v37 = vsel %vm492_vm12, %v1377_v33, -1e+30  ;;  %v1267_v19 = vmul.f32 0.25, %v1261_v17 }
 0xe54   : > { %v1385_v38 = vsel %vm678_vm11, %v1380_v37, -inf }
 0xe55   : > { %1275 = vmax.xlane.f32.xlu1 %v1274_v35  ;;  %1386 = vmax.xlane.f32.xlu0 %v1385_v38  ;;  %v1270_v42 = vsel %vm493_vm14, %v1267_v19, -1e+30 }
 0xe56   : > { %v1277_v11 = vsel %vm678_vm11, %v1270_v42, -inf }
 0xe58   : > { %v1372_v21 = vpop.f32.mrf.mxu3 }
 0xe59   : > { %v1378_v40 = vmul.f32 0.25, %v1372_v21 }
 0xe5a   : > { %v1263_v49 = vpop.f32.mrf.mxu1 }
 0xe5b   : > { %v1381_v27 = vsel %vm493_vm14, %v1378_v40, -1e+30 }
 0xe5c   : > { %v1388_v43 = vsel %vm678_vm11, %v1381_v27, -inf }
 0xe5d   : > { %1278 = vmax.xlane.f32.xlu1 %v1277_v11  ;;  %1389 = vmax.xlane.f32.xlu0 %v1388_v43 }
 0xe60   : > { %v1374_v41 = vpop.f32.mrf.mxu3 }
 0xe71   : > { %1419 = vrot.lane.b32.xlu0 %v2916_v59, %s2470_s16 }
 0xeba   : > { %v1273_v54 = vpop.xlane.xlu2 %1272 }
 0xebb   : > { %v1280_v62 = vsub.f32 %v1268_v18, %v1273_v54 }
 0xebd   : > { %v1283_v2 = vmul.f32 1.442695, %v1280_v62 }
 0xec0   : > { %v1384_v44 = vpop.xlane.xlu1 %1383 }
 0xec1   : > { %v1391_v30 = vsub.f32 %v1379_v50, %v1384_v44 }
 0xec3   : > { %v1394_v45 = vmul.f32 1.442695, %v1391_v30 }
 0xec5   : > { %2344 = vpow2.f32 %v1394_v45 }
 0xec8   : > { %v1276_v53 = vpop.xlane.xlu1 %1275  ;;  %v1387_v51 = vpop.xlane.xlu0 %1386 }
 0xec9   : > { %v1281_v55 = vsub.f32 %v1269_v34, %v1276_v53  ;;  %v1392_v22 = vsub.f32 %v1380_v37, %v1387_v51 }
 0xecb   : > { %v2345_v52 = vpop.eup %2344  ;;  %v1285_v58 = vmul.f32 1.442695, %v1281_v55  ;;  %v1396_v61 = vmul.f32 1.442695, %v1392_v22 }
 0xecc   : > { %v1400_v1 = vsel %vm678_vm11, %v2345_v52, 0.0 }
 0xecd   : > { %2346 = vpow2.f32 %v1285_v58  ;;  %1401 = vadd.xlane.f32.xlu2 %v1400_v1 }
 0xece   : > { %2348 = vpow2.f32 %v1396_v61 }
 0xecf   : > { %2350 = vpow2.f32 %v1283_v2 }
 0xed0   : > { %v1390_v3 = vpop.xlane.xlu0 %1389  ;;  %v1279_v28 = vpop.xlane.xlu1 %1278 }
 0xed1   : > { %v1393_v7 = vsub.f32 %v1381_v27, %v1390_v3  ;;  %v1282_v50 = vsub.f32 %v1270_v42, %v1279_v28 }
 0xed3   : > { %v2347_v4 = vpop.eup %2346  ;;  %v1398_v14 = vmul.f32 1.442695, %v1393_v7  ;;  %v1287_v29 = vmul.f32 1.442695, %v1282_v50 }
 0xed4   : > { %v2349_v5 = vpop.eup %2348  ;;  %v1292_v25 = vsel %vm678_vm11, %v2347_v4, 0.0 }
 0xed5   : > { %v1403_v12 = vsel %vm678_vm11, %v2349_v5, 0.0  ;;  %1293 = vadd.xlane.f32.xlu0 %v1292_v25  ;;  %v2351_v15 = vpop.eup %2350  ;;  %2352 = vpow2.f32 %v1398_v14 }
 0xed6   : > { %1404 = vadd.xlane.f32.xlu1 %v1403_v12  ;;  %v1289_v16 = vsel %vm678_vm11, %v2351_v15, 0.0  ;;  %2354 = vpow2.f32 %v1287_v29 }
 0xedb   : > { %v2353_v18 = vpop.eup %2352 }
 0xedc   : > { %v1406_v24 = vsel %vm678_vm11, %v2353_v18, 0.0  ;;  %v2355_v13 = vpop.eup %2354 }
 0xedd   : > { %v1295_v46 = vsel %vm678_vm11, %v2355_v13, 0.0 }
 0xede   : > { %1290 = vadd.xlane.f32.xlu1 %v1289_v16 }
 0xee3   : > { %v1420_v20 = vpop.permute.xlu0 %1419 }
 0xee4   : > { %v1429_v23 = vsel %vm725_vm15, %v1420_v20, 0 }
 0xee5   : > { %1417 = vrot.lane.b32.xlu2 %v2909_v57, %s2470_s16  ;;  %1437 = vmatpush.bf16.msrb.mxu2 %v1429_v23 }
 0xee6   : > { %1407 = vadd.xlane.f32.xlu1 %v1406_v24 }
 0xeed   : > { %1308 = vrot.lane.b32.xlu2 %v2916_v59, %s2471_s18 }
 0xeff   : > { %1306 = vrot.lane.b32.xlu1 %v2909_v57, %s2471_s18 }
 0xf07   : > { %1468 = vrot.lane.b32.xlu1 %v2885_v56, %s2472_s20 }
 0xf0f   : > { %1466 = vrot.lane.b32.xlu1 %v2892_v60, %s2472_s20 }
 0xf16   : > { %1296 = vadd.xlane.f32.xlu2 %v1295_v46 }
 0xf2e   : > { %1500 = vrot.lane.b32.xlu2 %v2905_v47, %s2472_s20 }
 0xf40   : > { %v1402_v59 = vpop.xlane.xlu2 %1401 }
 0xf41   : > { %2356 = vrcp.f32 %v1402_v59 }
 0xf47   : > { %v2357_v34 = vpop.eup %2356 }
 0xf48   : > { %v1418_v57 = vpop.permute.xlu2 %1417  ;;  %v1412_v37 = vmul.f32 %v2357_v34, %v2345_v52  ;;  %v1294_v49 = vpop.xlane.xlu0 %1293 }
 0xf49   : > { %v1405_v33 = vpop.xlane.xlu1 %1404  ;;  %1438 = vmatpush.bf16.msrb.mxu2 %v1418_v57 }
 0xf4a   : > { %2358 = vrcp.f32 %v1405_v33 }
 0xf50   : > { %v2359_v56 = vpop.eup %2358  ;;  %v1309_v17 = vpop.permute.xlu2 %1308 }
 0xf51   : > { %v1413_v35 = vmul.f32 %v2359_v56, %v2349_v5  ;;  %v1318_v60 = vsel %vm725_vm15, %v1309_v17, 0  ;;  %v1291_v38 = vpop.xlane.xlu1 %1290 }
 0xf52   : > { %1326 = vmatpush.bf16.msrb.mxu0 %v1318_v60 }
 0xf53   : > { %v1415_v19 = vpack.c.bf16 %v1413_v35, %v1412_v37 }
 0xf55   : > { %2158 = vmatmul.msk.bf16.vlgmr.msrb.gmra.mxu2 %vm678_vm11, %v1415_v19 }
 0xf59   : > { %v1408_v21 = vpop.xlane.xlu1 %1407 }
 0xf5a   : > { %2360 = vrcp.f32 %v1408_v21 }
 0xf5b   : > { %2362 = vrcp.f32 %v1291_v38 }
 0xf5c   : > { %2364 = vrcp.f32 %v1294_v49 }
 0xf60   : > { %v2361_v47 = vpop.eup %2360 }
 0xf61   : > { %v1414_v40 = vmul.f32 %v2361_v47, %v2353_v18  ;;  %v2363_v27 = vpop.eup %2362 }
 0xf62   : > { %v2365_v11 = vpop.eup %2364  ;;  %v1301_v43 = vmul.f32 %v2363_v27, %v2351_v15 }
 0xf63   : > { %v1416_v42 = vpack.c.bf16 %v1414_v40, %v1414_v40  ;;  %v1302_v41 = vmul.f32 %v2365_v11, %v2347_v4 }
 0xf65   : > { %2159 = vmatmul.msk.bf16.gmra.mxu2 %vm678_vm11, %v1416_v42  ;;  %v1304_v30 = vpack.c.bf16 %v1302_v41, %v1301_v43 }
 0xf71   : > { %v1307_v44 = vpop.permute.xlu1 %1306 }
 0xf72   : > { %1327 = vmatpush.bf16.msrb.mxu0 %v1307_v44  ;;  %v2205_v44 = vld [vmem:[%s3140_s2 + $0x48] sm:$0xff] }
 0xf75   : > { %2154 = vmatmul.msk.bf16.vlgmr.msrb.gmra.mxu0 %vm678_vm11, %v1304_v30 }
 0xf76   : > { %1611 = vmatpush.bf16.msra.mxu0 %v2205_v44 }
 0xf79   : > { %v1469_v62 = vpop.permute.xlu1 %1468 }
 0xf7a   : > { %1484 = vmatpush.bf16.msrb.mxu1 %v1469_v62 }
 0xf81   : > { %v1467_v2 = vpop.permute.xlu1 %1466 }
 0xf82   : > { %1485 = vmatpush.bf16.msrb.mxu1 %v1467_v2 }
 0xf89   : > { %v1297_v45 = vpop.xlane.xlu2 %1296 }
 0xf8a   : > { %2366 = vrcp.f32 %v1297_v45 }
 0xf90   : > { %v2367_v53 = vpop.eup %2366 }
 0xf91   : > { %v1303_v51 = vmul.f32 %v2367_v53, %v2355_v13  ;;  %v1501_v28 = vpop.permute.xlu2 %1500  ;;  %v2204_v53 = vld [vmem:[%s3140_s2 + $0x40] sm:$0xff] }
 0xf92   : > { %1612 = vmatpush.bf16.msra.mxu0 %v2204_v53 }
 0xf93   : > { %v1305_v54 = vpack.c.bf16 %v1303_v51, %v1303_v51 }
 0xf95   : > { %2155 = vmatmul.msk.bf16.gmra.mxu0 %vm678_vm11, %v1305_v54 }
 0xfd8   : > { %v1440_v55 = vpop.f32.mrf.mxu2 }
 0xfe0   : > { %v1442_v22 = vpop.f32.mrf.mxu2 }
 0xfe1   : > { %v2277_v52 = vpack.i.bf16 %v1442_v22, %v1440_v55 }
 0xfe3   : > { %2278 = vrot.lane.b32.xlu0 %v2277_v52, %s2462_s17 }
 0xfe8   : > { %v1445_v58 = vpop.f32.mrf.mxu2 }
 0xfe9   : > { %1456 = vrot.lane.b32.xlu1 %v1445_v58, %s2462_s17  ;;  %s1942_s17 = scalar_lea.hbm %s3142_s4, %s2210_s10 }
 0xfea   : > { %s1945_s15 = sshll.u32 %s1942_s17, 4  ;;  %s1946_s15 = int_to_ptr.hbm [resolvable:$true] %s1945_s15 }
 0xfeb   : > { %s2412_s16 = sshra.s32 %s1946_s15, 4  ;;  %s2413_s16 = int_to_ptr.hbm [resolvable:$true] %s2412_s16 }
 0xfec   : > { %p2419_p1 = scmp.lt.s32.totalorder %s2413_s16, %s3142_s4 }
 0xff0   : > { %v1447_v61 = vpop.f32.mrf.mxu2 }
 0xff2   : > { %v1329_v1 = vpop.f32.mrf.mxu0 }
 0xffa   : > { %v1331_v3 = vpop.f32.mrf.mxu0 }
0x1012   : > { %v1334_v4 = vpop.f32.mrf.mxu0 }
0x101a   : > { %v1336_v5 = vpop.f32.mrf.mxu0 }
0x1055   : > { %v2279_v7 = vpop.permute.xlu0 %2278 }
0x1056   : > { %v2281_v25 = vunpack.i.h.bf16 %v2279_v7  ;;  %v2280_v12 = vunpack.i.l.bf16 %v2279_v7 }
0x1058   : > { %v1462_v14 = vsel %vm334_vm0, %v1331_v3, %v2281_v25  ;;  %v1461_v15 = vsel %vm334_vm0, %v1329_v1, %v2280_v12 }
0x1059   : > { %v1464_v16 = vpack.c.bf16 %v1462_v14, %v1461_v15 }
0x105b   : > { %2160 = vmatmul.msk.bf16.vlgmr.msrb.gmra.mxu1 %vm510_vm13, %v1464_v16  ;;  %v1457_v18 = vpop.permute.xlu1 %1456 }
0x105c   : > { %v1463_v20 = vsel %vm334_vm0, %v1334_v4, %v1457_v18 }
0x105d   : > { %v1465_v23 = vpack.c.bf16 %v1463_v20, %v1463_v20 }
0x106b   : > { %2161 = vmatmul.msk.bf16.gmra.mxu1 %vm510_vm13, %v1465_v23 }
0x10d8   : > { %v1487_v24 = vpop.f32.mrf.mxu1 }
0x10d9   : > { %v1496_v50 = vadd.f32 %v1487_v24, %v2852_v31 }
0x10db   : > { %v2994_v29 = vadd.f32 %v1501_v28, %v1496_v50 }
0x10dd   : > { %v1506_v13 = vsel %vm510_vm13, %v2994_v29, 0.0 }
0x10de   : > { %1507 = vadd.xlane.f32.xlu1 %v1506_v13 }
0x10e0   : > { %v1489_v46 = vpop.f32.mrf.mxu1 }
0x10e1   : > { %v1497_v59 = vadd.f32 %v1489_v46, %v2857_v36 }
0x10e3   : > { %v2999_v57 = vadd.f32 %v1501_v28, %v1497_v59 }
0x10e5   : > { %v1509_v33 = vsel %vm510_vm13, %v2999_v57, 0.0 }
0x10e6   : > { %1510 = vadd.xlane.f32.xlu0 %v1509_v33 }
0x10e8   : > { %v1492_v34 = vpop.f32.mrf.mxu1 }
0x10e9   : > { %v1498_v56 = vadd.f32 %v1492_v34, %v2862_v39 }
0x10eb   : > { %v3004_v17 = vadd.f32 %v1501_v28, %v1498_v56 }
0x10ed   : > { %v1512_v31 = vsel %vm510_vm13, %v3004_v17, 0.0 }
0x10ee   : > { %1513 = vadd.xlane.f32.xlu2 %v1512_v31 }
0x10f0   : > { %v1494_v37 = vpop.f32.mrf.mxu1 }
0x1151   : > { %v1508_v35 = vpop.xlane.xlu1 %1507 }
0x1152   : > { %v1515_v60 = vmul.f32 %v1508_v35, %v2656_v32 }
0x1154   : > { %v1518_v36 = vsub.f32 %v2994_v29, %v1515_v60 }
0x1156   : > { %v1521_v38 = vmul.f32 %v1518_v36, %v1518_v36 }
0x1158   : > { %v1524_v19 = vsel %vm510_vm13, %v1521_v38, 0.0 }
0x1159   : > { %1525 = vadd.xlane.f32.xlu1 %v1524_v19  ;;  %v1511_v21 = vpop.xlane.xlu0 %1510 }
0x115a   : > { %v1516_v47 = vmul.f32 %v1511_v21, %v2656_v32 }
0x115c   : > { %v1519_v39 = vsub.f32 %v2999_v57, %v1516_v47 }
0x115e   : > { %v1522_v40 = vmul.f32 %v1519_v39, %v1519_v39 }
0x1160   : > { %v1527_v42 = vsel %vm510_vm13, %v1522_v40, 0.0  ;;  %v2206_v40 = vld [vmem:[%s3140_s2 + $0x50] sm:$0xff] }
0x1161   : > { %1528 = vadd.xlane.f32.xlu0 %v1527_v42  ;;  %v1514_v49 = vpop.xlane.xlu2 %1513  ;;  %v2290_v42 = vld [vmem:[%s3141_s3 + $0x6] ss:$0 sm:$0xff] }
0x1162   : > { %v1517_v27 = vmul.f32 %v1514_v49, %v2656_v32 }
0x1164   : > { %v1520_v11 = vsub.f32 %v3004_v17, %v1517_v27 }
0x1166   : > { %v1523_v43 = vmul.f32 %v1520_v11, %v1520_v11 }
0x1168   : > { %v1530_v41 = vsel %vm510_vm13, %v1523_v43, 0.0 }
0x1169   : > { %1531 = vadd.xlane.f32.xlu2 %v1530_v41 }
0x1172   : > { %1572 = vrot.lane.b32.xlu1 %v2878_v48, %s2471_s18  ;;  %s2414_s18 = scalar_lea.hbm %s2413_s16, 24 }
0x1173   : > { %p2415_p12 = scmp.ne.s32.totalorder %s2413_s16, %s2414_s18  ;;  %p2420_p2 = scmp.lt.s32.totalorder %s2418_s25, %s2414_s18 }
0x1175   : > { %1578 = vrot.lane.b32.xlu0 %v2878_v48, %s2472_s20  ;;  %p2416_p13 = pnand %p2415_p12, %p2548_p5  ;;  %p2421_p3 = por %p2420_p2, %p2419_p1 }
0x1177   : > { %p2417_p0 = pneg %p2416_p13 }
0x1179   : > { %p2422_p4 = pnand %p2421_p3, %p2417_p0 }
0x11cc   : > { %v1526_v30 = vpop.xlane.xlu1 %1525 }
0x11cd   : > { %v1533_v45 = vmul.f32 %v1526_v30, %v2656_v32 }
0x11cf   : > { %v1536_v51 = vadd.f32 1e-05, %v1533_v45 }
0x11d1   : > { %2368 = vrsqrt.f32 %v1536_v51  ;;  %vm1545_vm9 = vweird.f32 %v1536_v51 }
0x11d4   : > { %v1529_v54 = vpop.xlane.xlu0 %1528 }
0x11d5   : > { %v1534_v55 = vmul.f32 %v1529_v54, %v2656_v32 }
0x11d7   : > { %v2369_v22 = vpop.eup %2368  ;;  %v1537_v48 = vadd.f32 1e-05, %v1534_v55 }
0x11d8   : > { %v1540_v52 = vmul.f32 %v2369_v22, %v1536_v51  ;;  %vm1546_vm0 = vweird.f32 %v2369_v22 }
0x11d9   : > { %2370 = vrsqrt.f32 %v1537_v48  ;;  %vm1547_vm11 = vmor %vm1545_vm9, %vm1546_vm0  ;;  %vm1555_vm14 = vweird.f32 %v1537_v48 }
0x11da   : > { %v1541_v58 = vmul.f32 %v2369_v22, %v1540_v52 }
0x11dc   : > { %v1542_v61 = vmul.f32 0.5, %v1541_v58  ;;  %v1532_v62 = vpop.xlane.xlu2 %1531 }
0x11dd   : > { %v1535_v1 = vmul.f32 %v1532_v62, %v2656_v32 }
0x11de   : > { %v1543_v2 = vsub.f32 1.5, %v1542_v61 }
0x11df   : > { %v2371_v3 = vpop.eup %2370  ;;  %v1538_v4 = vadd.f32 1e-05, %v1535_v1 }
0x11e0   : > { %v1544_v5 = vmul.f32 %v2369_v22, %v1543_v2  ;;  %v1550_v7 = vmul.f32 %v2371_v3, %v1537_v48  ;;  %vm1556_vm12 = vweird.f32 %v2371_v3 }
0x11e1   : > { %2372 = vrsqrt.f32 %v1538_v4  ;;  %vm1557_vm15 = vmor %vm1555_vm14, %vm1556_vm12  ;;  %vm1565_vm4 = vweird.f32 %v1538_v4  ;;  %vm1811_vm14 = vcmp.lt.s32.totalorder %v2598_v26, 48 }
0x11e2   : > { %v1551_v25 = vmul.f32 %v2371_v3, %v1550_v7  ;;  %v1548_v14 = vsel %vm1547_vm11, %v2369_v22, %v1544_v5 }
0x11e3   : > { %v1569_v18 = vmul.f32 %v1548_v14, %v1518_v36 }
0x11e4   : > { %v1552_v12 = vmul.f32 0.5, %v1551_v25  ;;  %v1573_v24 = vpop.permute.xlu1 %1572 }
0x11e5   : > { %v1575_v46 = vmul.f32 %v1573_v24, %v1569_v18 }
0x11e6   : > { %v1553_v15 = vsub.f32 1.5, %v1552_v12 }
0x11e7   : > { %v2373_v16 = vpop.eup %2372  ;;  %v1579_v33 = vpop.permute.xlu0 %1578 }
0x11e8   : > { %v1554_v20 = vmul.f32 %v2371_v3, %v1553_v15  ;;  %v1560_v23 = vmul.f32 %v2373_v16, %v1538_v4  ;;  %vm1566_vm3 = vweird.f32 %v2373_v16  ;;  %v1581_v31 = vadd.f32 %v1579_v33, %v1575_v46  ;;  %v2291_v46 = vld [vmem:[%s3141_s3 + $0x7] ss:$0 sm:$0xff] }
0x11e9   : > { %vm1567_vm5 = vmor %vm1565_vm4, %vm1566_vm3 }
0x11ea   : > { %v1561_v28 = vmul.f32 %v2373_v16, %v1560_v23  ;;  %v1558_v50 = vsel %vm1557_vm15, %v2371_v3, %v1554_v20  ;;  %vm1886_vm15 = vcmask 6144  }
0x11eb   : > { %v1570_v13 = vmul.f32 %v1558_v50, %v1519_v39  ;;  %v2207_v39 = vld [vmem:[%s3140_s2 + $0x58] sm:$0xff] }
0x11ec   : > { %v1562_v59 = vmul.f32 0.5, %v1561_v28  ;;  %1671 = vmatpush.bf16.xpose.msra.mxu3 %v2207_v39 }
0x11ed   : > { %v1576_v34 = vmul.f32 %v1573_v24, %v1570_v13 }
0x11ee   : > { %v1563_v56 = vsub.f32 1.5, %v1562_v59 }
0x11ef   : > { %v1582_v37 = vadd.f32 %v1579_v33, %v1576_v34 }
0x11f0   : > { %v1564_v35 = vmul.f32 %v2373_v16, %v1563_v56 }
0x11f1   : > { %v1584_v60 = vpack.c.bf16 %v1582_v37, %v1581_v31 }
0x11f2   : > { %v1568_v36 = vsel %vm1567_vm5, %v2373_v16, %v1564_v35 }
0x11f3   : > { %2170 = vmatmul.msk.bf16.vlgmr.msra.gmra.mxu0 %vm510_vm13, %v1584_v60  ;;  %v1571_v38 = vmul.f32 %v1568_v36, %v1520_v11 }
0x11f4   : > { %1672 = vmatpush.bf16.xpose.msra.mxu3 %v2206_v40 }
0x11f5   : > { %v1577_v19 = vmul.f32 %v1573_v24, %v1571_v38 }
0x11f7   : > { %v1583_v21 = vadd.f32 %v1579_v33, %v1577_v19 }
0x11f9   : > { %v1585_v47 = vpack.c.bf16 %v1583_v21, %v1583_v21 }
0x1203   : > { %2171 = vmatmul.msk.bf16.gmra.mxu0 %vm510_vm13, %v1585_v47 }
0x1270   : > { %v1614_v49 = vpop.f32.mrf.mxu0 }
0x1271   : > { %v1615_v27 = vadd.f32 %v2290_v42, %v1614_v49 }
0x1273   : > { %v1623_v11 = vmul.f32 %v1615_v27, %v1615_v27 }
0x1275   : > { %v1626_v43 = vmul.f32 %v1623_v11, %v1615_v27 }
0x1277   : > { %v1629_v41 = vmul.f32 0.044715, %v1626_v43 }
0x1278   : > { %v1616_v44 = vpop.f32.mrf.mxu0 }
0x1279   : > { %v1632_v30 = vadd.f32 %v1629_v41, %v1615_v27  ;;  %v1617_v45 = vadd.f32 %v2290_v42, %v1616_v44 }
0x127b   : > { %v1635_v53 = vmul.f32 0.7978846, %v1632_v30  ;;  %v1624_v51 = vmul.f32 %v1617_v45, %v1617_v45 }
0x127d   : > { %v1627_v54 = vmul.f32 %v1624_v51, %v1617_v45  ;;  %2374 = vtanh.f32 %v1635_v53  ;;  %v2292_v51 = vld [vmem:[%s3141_s3 + $0x9] ss:$0 sm:$0xff] }
0x127f   : > { %v1630_v55 = vmul.f32 0.044715, %v1627_v54  ;;  %v2209_v54 = vld [vmem:[%s3140_s2 + $0x78] sm:$0xff] }
0x1280   : > { %v1619_v22 = vpop.f32.mrf.mxu0  ;;  %1796 = vmatpush.bf16.msra.mxu2 %v2209_v54 }
0x1281   : > { %v1633_v48 = vadd.f32 %v1630_v55, %v1617_v45  ;;  %v1620_v52 = vadd.f32 %v2290_v42, %v1619_v22 }
0x1283   : > { %v1636_v58 = vmul.f32 0.7978846, %v1633_v48  ;;  %v1625_v61 = vmul.f32 %v1620_v52, %v1620_v52  ;;  %v2375_v62 = vpop.eup %2374  ;;  %v2208_v48 = vld [vmem:[%s3140_s2 + $0x70] sm:$0xff] }
0x1284   : > { %v1641_v3 = vadd.f32 1.0, %v2375_v62  ;;  %1797 = vmatpush.bf16.msra.mxu2 %v2208_v48 }
0x1285   : > { %2376 = vtanh.f32 %v1636_v58  ;;  %v1628_v1 = vmul.f32 %v1625_v61, %v1620_v52 }
0x1286   : > { %v1644_v12 = vmul.f32 0.5, %v1641_v3 }
0x1287   : > { %v1631_v2 = vmul.f32 0.044715, %v1628_v1 }
0x1288   : > { %v1621_v4 = vpop.f32.mrf.mxu0  ;;  %v1647_v16 = vmul.f32 %v1644_v12, %v1615_v27 }
0x1289   : > { %v1634_v5 = vadd.f32 %v1631_v2, %v1620_v52 }
0x128b   : > { %v2377_v7 = vpop.eup %2376  ;;  %v1637_v25 = vmul.f32 0.7978846, %v1634_v5 }
0x128c   : > { %v1642_v14 = vadd.f32 1.0, %v2377_v7 }
0x128d   : > { %2378 = vtanh.f32 %v1637_v25 }
0x128e   : > { %v1645_v15 = vmul.f32 0.5, %v1642_v14 }
0x1290   : > { %v1648_v18 = vmul.f32 %v1645_v15, %v1617_v45 }
0x1292   : > { %v1650_v20 = vpack.c.bf16 %v1648_v18, %v1647_v16 }
0x1293   : > { %v2379_v23 = vpop.eup %2378 }
0x1294   : > { %1673 = vmatmul.bf16.vlgmr.msra.gmra.mxu3 %v1650_v20  ;;  %v1643_v24 = vadd.f32 1.0, %v2379_v23 }
0x1296   : > { %v1646_v28 = vmul.f32 0.5, %v1643_v24 }
0x1298   : > { %v1649_v50 = vmul.f32 %v1646_v28, %v1620_v52 }
0x129a   : > { %v1651_v13 = vpack.c.bf16 %v1649_v50, %v1649_v50 }
0x12a4   : > { %1678 = vmatmul.bf16.gmra.mxu3 %v1651_v13 }
0x1317   : > { %v1674_v59 = vpop.f32.mrf.mxu3 }
0x1318   : > { %v1675_v33 = vadd.f32 %v2291_v46, %v1674_v59 }
0x131a   : > { %v1683_v34 = vadd.f32 %v1675_v33, %v2994_v29 }
0x131c   : > { %v1692_v56 = vsel %vm510_vm13, %v1683_v34, 0.0 }
0x131d   : > { %1693 = vadd.xlane.f32.xlu2 %v1692_v56 }
0x131f   : > { %v1676_v31 = vpop.f32.mrf.mxu3 }
0x1320   : > { %v1677_v37 = vadd.f32 %v2291_v46, %v1676_v31 }
0x1322   : > { %v1684_v35 = vadd.f32 %v1677_v37, %v2999_v57 }
0x1324   : > { %v1695_v60 = vsel %vm510_vm13, %v1684_v35, 0.0 }
0x1325   : > { %1696 = vadd.xlane.f32.xlu0 %v1695_v60 }
0x1327   : > { %v1679_v36 = vpop.f32.mrf.mxu3 }
0x1328   : > { %v1680_v38 = vadd.f32 %v2291_v46, %v1679_v36 }
0x132a   : > { %v1685_v19 = vadd.f32 %v1680_v38, %v3004_v17 }
0x132c   : > { %v1698_v21 = vsel %vm510_vm13, %v1685_v19, 0.0 }
0x132d   : > { %1699 = vadd.xlane.f32.xlu1 %v1698_v21 }
0x132f   : > { %v1681_v47 = vpop.f32.mrf.mxu3 }
0x1390   : > { %v1694_v39 = vpop.xlane.xlu2 %1693 }
0x1391   : > { %v1701_v29 = vmul.f32 %v1694_v39, %v2656_v32 }
0x1393   : > { %v1704_v40 = vsub.f32 %v1683_v34, %v1701_v29 }
0x1395   : > { %v1707_v42 = vmul.f32 %v1704_v40, %v1704_v40 }
0x1397   : > { %v1710_v49 = vsel %vm510_vm13, %v1707_v42, 0.0  ;;  %v2293_v42 = vld [vmem:[%s3141_s3 + $0x8] ss:$0 sm:$0xff] }
0x1398   : > { %v1697_v27 = vpop.xlane.xlu0 %1696  ;;  %1711 = vadd.xlane.f32.xlu2 %v1710_v49 }
0x1399   : > { %v1702_v57 = vmul.f32 %v1697_v27, %v2656_v32 }
0x139b   : > { %v1705_v11 = vsub.f32 %v1684_v35, %v1702_v57 }
0x139d   : > { %v1708_v43 = vmul.f32 %v1705_v11, %v1705_v11 }
0x139f   : > { %v1713_v41 = vsel %vm510_vm13, %v1708_v43, 0.0 }
0x13a0   : > { %v1700_v17 = vpop.xlane.xlu1 %1699  ;;  %1714 = vadd.xlane.f32.xlu2 %v1713_v41 }
0x13a1   : > { %v1703_v44 = vmul.f32 %v1700_v17, %v2656_v32 }
0x13a3   : > { %v1706_v30 = vsub.f32 %v1685_v19, %v1703_v44 }
0x13a5   : > { %v1709_v45 = vmul.f32 %v1706_v30, %v1706_v30 }
0x13a7   : > { %v1716_v53 = vsel %vm510_vm13, %v1709_v45, 0.0 }
0x13a8   : > { %1717 = vadd.xlane.f32.xlu2 %v1716_v53 }
0x13c0   : > { %1763 = vrot.lane.b32.xlu2 %v2292_v51, %s2467_s28  ;;  %s257_s28 = sand.u32 1, %s2452_s22  }
0x13c1   : > { %s2213_s20 = smul.u32 24, %s257_s28  ;;  %s1923_s13 = scalar_lea.sflag [#allocation3], %s257_s28 }
0x13c3   : > { %s3078_s29 = scalar_lea.vmem [#allocation2], %s2213_s20 }
0x13c4   : > { %s1943_s9 = sshll.u32 %s3078_s29, 4  ;;  %s1944_s9 = int_to_ptr.vmem [resolvable:$true] %s1943_s9 }
0x140b   : > { %v1712_v55 = vpop.xlane.xlu2 %1711 }
0x140c   : > { %v1719_v22 = vmul.f32 %v1712_v55, %v2656_v32 }
0x140e   : > { %v1722_v52 = vadd.f32 1e-05, %v1719_v22 }
0x1410   : > { %2380 = vrsqrt.f32 %v1722_v52  ;;  %vm1731_vm7 = vweird.f32 %v1722_v52 }
0x1413   : > { %v1715_v58 = vpop.xlane.xlu2 %1714 }
0x1414   : > { %v1720_v61 = vmul.f32 %v1715_v58, %v2656_v32 }
0x1416   : > { %v2381_v62 = vpop.eup %2380  ;;  %v1723_v1 = vadd.f32 1e-05, %v1720_v61 }
0x1417   : > { %v1726_v2 = vmul.f32 %v2381_v62, %v1722_v52  ;;  %vm1732_vm6 = vweird.f32 %v2381_v62 }
0x1418   : > { %2382 = vrsqrt.f32 %v1723_v1  ;;  %vm1733_vm8 = vmor %vm1731_vm7, %vm1732_vm6  ;;  %vm1741_vm2 = vweird.f32 %v1723_v1 }
0x1419   : > { %v1727_v3 = vmul.f32 %v2381_v62, %v1726_v2 }
0x141b   : > { %v1728_v4 = vmul.f32 0.5, %v1727_v3  ;;  %v1718_v5 = vpop.xlane.xlu2 %1717 }
0x141c   : > { %v1721_v7 = vmul.f32 %v1718_v5, %v2656_v32 }
0x141d   : > { %v1729_v25 = vsub.f32 1.5, %v1728_v4 }
0x141e   : > { %v2383_v12 = vpop.eup %2382  ;;  %v1724_v14 = vadd.f32 1e-05, %v1721_v7 }
0x141f   : > { %v1730_v15 = vmul.f32 %v2381_v62, %v1729_v25  ;;  %v1736_v16 = vmul.f32 %v2383_v12, %v1723_v1  ;;  %vm1742_vm1 = vweird.f32 %v2383_v12 }
0x1420   : > { %2384 = vrsqrt.f32 %v1724_v14  ;;  %vm1743_vm0 = vmor %vm1741_vm2, %vm1742_vm1  ;;  %vm1751_vm11 = vweird.f32 %v1724_v14 }
0x1421   : > { %v1737_v18 = vmul.f32 %v2383_v12, %v1736_v16  ;;  %v1734_v23 = vsel %vm1733_vm8, %v2381_v62, %v1730_v15 }
0x1422   : > { %v1755_v50 = vmul.f32 %v1734_v23, %v1704_v40 }
0x1423   : > { %v1738_v20 = vmul.f32 0.5, %v1737_v18  ;;  %v1764_v31 = vpop.permute.xlu2 %1763 }
0x1424   : > { %v1759_v34 = vmul.f32 %v2292_v51, %v1755_v50 }
0x1425   : > { %v1739_v24 = vsub.f32 1.5, %v1738_v20 }
0x1426   : > { %v2385_v28 = vpop.eup %2384  ;;  %v1766_v60 = vadd.f32 %v1764_v31, %v1759_v34 }
0x1427   : > { %v1740_v13 = vmul.f32 %v2383_v12, %v1739_v24  ;;  %v1746_v46 = vmul.f32 %v2385_v28, %v1724_v14  ;;  %vm1752_vm9 = vweird.f32 %v2385_v28 }
0x1428   : > { %vm1753_vm12 = vmor %vm1751_vm11, %vm1752_vm9 }
0x1429   : > { %v1747_v32 = vmul.f32 %v2385_v28, %v1746_v46  ;;  %v1744_v59 = vsel %vm1743_vm0, %v2383_v12, %v1740_v13 }
0x142a   : > { %v1756_v33 = vmul.f32 %v1744_v59, %v1705_v11 }
0x142b   : > { %v1748_v56 = vmul.f32 0.5, %v1747_v32 }
0x142c   : > { %v1760_v37 = vmul.f32 %v2292_v51, %v1756_v33 }
0x142d   : > { %v1749_v35 = vsub.f32 1.5, %v1748_v56 }
0x142e   : > { %v1767_v36 = vadd.f32 %v1764_v31, %v1760_v37 }
0x142f   : > { %v1750_v38 = vmul.f32 %v2385_v28, %v1749_v35 }
0x1430   : > { %v1769_v19 = vpack.c.bf16 %v1767_v36, %v1766_v60 }
0x1431   : > { %v1754_v21 = vsel %vm1753_vm12, %v2385_v28, %v1750_v38 }
0x1432   : > { %2188 = vmatmul.msk.bf16.vlgmr.msra.gmra.mxu2 %vm510_vm13, %v1769_v19  ;;  %v1757_v47 = vmul.f32 %v1754_v21, %v1706_v30 }
0x1434   : > { %v1761_v39 = vmul.f32 %v2292_v51, %v1757_v47 }
0x1436   : > { %v1768_v29 = vadd.f32 %v1764_v31, %v1761_v39 }
0x1438   : > { %v1770_v40 = vpack.c.bf16 %v1768_v29, %v1768_v29 }
0x1442   : > { %2189 = vmatmul.msk.bf16.gmra.mxu2 %vm510_vm13, %v1770_v40  ;;  %vm1870_vm13 = vcmp.lt.s32.totalorder %v2729_v0, 7 }
0x1443   : > { %v2190_v12 = vsel %vm1870_vm13, 1.0, %v2464_v63 }
0x1444   : > { %v1898_v18 = vsub.f32 1.0, %v2190_v12 }
0x14b5   : > { %v1799_v49 = vpop.f32.mrf.mxu2 }
0x14b6   : > { %v1800_v27 = vadd.f32 %v2293_v42, %v1799_v49 }
0x14b8   : > { %1808 = vst [vmem:[%s3078_s29] sm:$0xff] %v1800_v27  ;;  %v1812_v57 = vsel %vm1811_vm14, %v1800_v27, -1e+30  ;;  %v1857_v11 = vmul.f32 %v2623_v6, %v1800_v27 }
0x14b9   : > { %1815 = vmax.xlane.f32.xlu0 %v1812_v57 }
0x14bd   : > { %v1801_v43 = vpop.f32.mrf.mxu2 }
0x14be   : > { %v1802_v41 = vadd.f32 %v2293_v42, %v1801_v43 }
0x14c0   : > { %1809 = vst [vmem:[%s3078_s29 + $0x8] sm:$0xff] %v1802_v41  ;;  %v1813_v17 = vsel %vm1811_vm14, %v1802_v41, -1e+30  ;;  %v1858_v44 = vmul.f32 %v2633_v10, %v1802_v41 }
0x14c1   : > { %1817 = vmax.xlane.f32.xlu1 %v1813_v17 }
0x14c5   : > { %v1804_v30 = vpop.f32.mrf.mxu2 }
0x14c6   : > { %v1805_v45 = vadd.f32 %v2293_v42, %v1804_v30 }
0x14c8   : > { %1810 = vst [vmem:[%s3078_s29 + $0x10] sm:$0xff] %v1805_v45  ;;  %v1814_v53 = vsel %vm1811_vm14, %v1805_v45, -1e+30  ;;  %v1859_v51 = vmul.f32 %v1852_v9, %v1805_v45 }
0x14c9   : > { %1819 = vmax.xlane.f32.xlu0 %v1814_v53 }
0x14ca   : > { %v1864_v9 = vsel %vm1848_vm10, %v1859_v51, 0.0  ;;  %vm1882_vm10 = vcmask 7168  }
0x14cd   : > { %v1806_v6 = vpop.f32.mrf.mxu2 }
0x152c   : > { %v1816_v54 = vpop.xlane.xlu0 %1815 }
0x152d   : > { %v1821_v55 = vsub.f32 %v1812_v57, %v1816_v54 }
0x152f   : > { %v1824_v22 = vmul.f32 1.442695, %v1821_v55 }
0x1531   : > { %2386 = vpow2.f32 %v1824_v22 }
0x1534   : > { %v1818_v48 = vpop.xlane.xlu1 %1817 }
0x1535   : > { %v1822_v52 = vsub.f32 %v1813_v17, %v1818_v48 }
0x1537   : > { %v2387_v58 = vpop.eup %2386  ;;  %v1826_v10 = vmul.f32 1.442695, %v1822_v52 }
0x1538   : > { %1830 = vadd.xlane.f32.xlu1 %v2387_v58 }
0x1539   : > { %2388 = vpow2.f32 %v1826_v10 }
0x153c   : > { %v1820_v61 = vpop.xlane.xlu0 %1819 }
0x153d   : > { %v1823_v62 = vsub.f32 %v1814_v53, %v1820_v61 }
0x153f   : > { %v2389_v1 = vpop.eup %2388  ;;  %v1828_v26 = vmul.f32 1.442695, %v1823_v62 }
0x1540   : > { %1832 = vadd.xlane.f32.xlu2 %v2389_v1  ;;  %1860 = vadd.xlane.f32.xlu1 %v1857_v11 }
0x1541   : > { %2390 = vpow2.f32 %v1828_v26 }
0x1547   : > { %v2391_v8 = vpop.eup %2390 }
0x1548   : > { %1834 = vadd.xlane.f32.xlu0 %v2391_v8  ;;  %1865 = vadd.xlane.f32.xlu1 %v1864_v9 }
0x1550   : > { %1862 = vadd.xlane.f32.xlu0 %v1858_v44 }
0x15ab   : > { %v1831_v2 = vpop.xlane.xlu1 %1830 }
0x15ac   : > { %2392 = vlog2.f32 %v1831_v2 }
0x15b2   : > { %v2393_v3 = vpop.eup %2392 }
0x15b3   : > { %v1833_v4 = vpop.xlane.xlu2 %1832  ;;  %v1837_v5 = vmul.f32 0.6931472, %v2393_v3  ;;  %v1861_v15 = vpop.xlane.xlu1 %1860 }
0x15b4   : > { %2394 = vlog2.f32 %v1833_v4 }
0x15b5   : > { %v1842_v7 = vadd.f32 %v1837_v5, %v1816_v54 }
0x15b7   : > { %v1867_v20 = vsub.f32 %v1842_v7, %v1861_v15 }
0x15b9   : > { %v1901_v24 = vmul.f32 %v1898_v18, %v1867_v20  ;;  %v1879_v46 = vmul.f32 %v2190_v12, %v1867_v20 }
0x15ba   : > { %v2395_v25 = vpop.eup %2394 }
0x15bb   : > { %v1835_v14 = vpop.xlane.xlu0 %1834  ;;  %v1839_v16 = vmul.f32 0.6931472, %v2395_v25  ;;  %v1866_v0 = vpop.xlane.xlu1 %1865  ;;  %v1904_v63 = vsel %vm1882_vm10, %v1901_v24, 0.0  ;;  %v1883_v37 = vsel %vm1882_vm10, %v1879_v46, 0.0 }
0x15bc   : > { %2396 = vlog2.f32 %v1835_v14 }
0x15bd   : > { %v1843_v28 = vadd.f32 %v1839_v16, %v1818_v48 }
0x15c2   : > { %v2397_v23 = vpop.eup %2396 }
0x15c3   : > { %v1841_v50 = vmul.f32 0.6931472, %v2397_v23  ;;  %v1863_v13 = vpop.xlane.xlu0 %1862 }
0x15c4   : > { %v1868_v32 = vsub.f32 %v1843_v28, %v1863_v13 }
0x15c5   : > { %v1844_v59 = vadd.f32 %v1841_v50, %v1820_v61 }
0x15c6   : > { %v1880_v33 = vmul.f32 0.0, %v1868_v32  ;;  %v1905_v34 = vsel %vm1882_vm10, %v1868_v32, 0.0 }
0x15c7   : > { %v1869_v56 = vsub.f32 %v1844_v59, %v1866_v0  ;;  %v1906_v31 = vadd.f32 %v1905_v34, %v1904_v63 }
0x15c8   : > { %v1884_v35 = vsel %vm1882_vm10, %v1880_v33, 0.0 }
0x15c9   : > { %v1881_v60 = vmul.f32 0.0, %v1869_v56  ;;  %v1907_v36 = vsel %vm1886_vm15, %v1869_v56, 0.0  ;;  %v1885_v38 = vadd.f32 %v1884_v35, %v1883_v37 }
0x15ca   : > { %v1908_v19 = vadd.f32 %v1907_v36, %v1906_v31 }
0x15cb   : > { %v1887_v21 = vsel %vm1886_vm15, %v1881_v60, 0.0 }
0x15cc   : > { %1909 = vadd.xlane.f32.xlu1 %v1908_v19  ;;  %v1888_v47 = vadd.f32 %v1887_v21, %v1885_v38 }
0x15ce   : > { %1889 = vadd.xlane.f32.xlu0 %v1888_v47 }
0x15cf   : > { %2425 = shalt.err (!%p2422_p4)
}
0x15d0   : > { %s2473_s28 = smov 128   ;;  %s2474_s10 = smov 8  }
0x15d1   : > { %2218 = dma.vmem_to_hbm [thread:$0]  (%p2548_p5), %s1944_s9, 384, %s1946_s15, %s1923_s13, %s2473_s28, %s2473_s28, %s2474_s10  }
0x15d2   : > { %s286_s11 = scalar_lea.vmem %s3143_s5, %s2606_s19  ;;  %s290_s13 = scalar_lea.vmem %s3144_s6, %s2606_s19 }
0x163f   : > { %v1910_v39 = vpop.xlane.xlu1 %1909 }
0x1640   : > { %v1911_v29 = vrot.slane %v1910_v39, 4 }
0x1641   : > { %v1890_v40 = vpop.xlane.xlu0 %1889 }
0x1642   : > { %v1912_v42 = vadd.f32 %v1911_v29, %v1910_v39  ;;  %v1891_v49 = vrot.slane %v1890_v40, 4 }
0x1644   : > { %v1913_v27 = vrot.slane %v1912_v42, 2  ;;  %v1892_v57 = vadd.f32 %v1891_v49, %v1890_v40 }
0x1646   : > { %v1914_v11 = vadd.f32 %v1913_v27, %v1912_v42  ;;  %v1893_v43 = vrot.slane %v1892_v57, 2 }
0x1648   : > { %v1894_v41 = vadd.f32 %v1893_v43, %v1892_v57  ;;  %v1915_v17 = vrot.slane %v1914_v11, 1 }
0x164a   : > { %v1895_v44 = vrot.slane %v1894_v41, 1  ;;  %v1916_v45 = vadd.f32 %v1915_v17, %v1914_v11 }
0x164c   : > { %v1896_v30 = vadd.f32 %v1895_v44, %v1894_v41 }
0x164e   : > { %2214 = vpush %v1896_v30 }
0x164f   : > { %2216 = vpush %v1916_v45 }
0x167f   : > { %s2215_s12 = spop %2214 }
0x1680   : > { %v1918_v53 = vstv %s2215_s12  ;;  %s2217_s16 = spop %2216 }
0x1681   : > { %1919 = vst [vmem:[%s286_s11] sm:$0xff] %v1918_v53  ;;  %v1920_v51 = vstv %s2217_s16 }
0x1682   : > { %1921 = vst [vmem:[%s290_s13] sm:$0xff] %v1920_v51 }
0x1683 PF: > { %p2224_p5 = scmp.ge.s32.totalorder %s2460_s24, 2  ;;  %s1966_s18 = sand.u32 1, %s2448_s21  }
0x1684   : > { %s1967_s20 = scalar_lea.sflag [#allocation3], %s1966_s18 }
0x1685   : > { %p2221_p7 = pnand %p2224_p5, %p2552_p6 }
0x1687   : > { %p2222_p8 = pneg %p2221_p7 }
0x1689   : > { %2443 = dma.done.wait (%p2222_p8), %s1967_s20, 384  }
0x168a   : > { %2445 = vsyncadd (%p2222_p8), %s1967_s20, 4294966912  ;;  %p17_p9 = scmp.ge.s32.totalorder %s2535_s27, 4   ;;  %s3147_s21 = smov %s2452_s22 }
0x168b   : > { %s3148_s22 = smov %s2456_s23  ;;  %s3149_s23 = smov %s2546_s30 }
0x168c   : > { %s3150_s24 = smov %s2535_s27  ;;  %19 = sbr.rel (!%p17_p9) target bundleno = 3 (0x3), region = 98 }
0x1691   :  { %1987 = vsyncpa [#allocation3], 1 }
0x1692   :  { %1989 = vsyncpa [#allocation3 + $0x1], 1 }

</bundles_post_ra>
